<compile_context>
chip_gen: v6e
topology: v6e:2x2x1
jax: 0.10.0
libtpu: 0.0.40
codegen_flags: <defaults>
</compile_context>

<pallas_src>
import functools
import math

import jax
import jax.numpy as jnp
from jax import lax
from jax.experimental import pallas as pl
from jax.experimental.pallas import tpu as pltpu

_LN_EPS = 1e-5  # torch.nn.LayerNorm default


def _layer_norm(x, gamma, beta):
    mu = jnp.mean(x, axis=-1, keepdims=True)
    xc = x - mu
    var = jnp.mean(xc * xc, axis=-1, keepdims=True)
    return xc * lax.rsqrt(var + _LN_EPS) * gamma + beta


def _transformer_block_kernel(num_heads, q_tile,
                              x_ref, g1_ref, be1_ref,
                              wq_ref, bq_ref, wkv_ref, bkv_ref,
                              wo_ref, bo_ref,
                              g2_ref, be2_ref,
                              w1_ref, b1_ref, w2_ref, b2_ref,
                              o_ref, ctx_ref):
    S = x_ref.shape[1]
    E = x_ref.shape[2]
    H = num_heads
    Dh = E // H
    cdt = x_ref.dtype                                  # MXU operand dtype
    exact_recip = jnp.dtype(cdt) == jnp.dtype(jnp.float32)
    # The PyTorch module divides scores by sqrt(Dh) twice -> net 1/Dh.
    scale = 1.0 / float(Dh)

    g1 = g1_ref[...].astype(jnp.float32)
    be1 = be1_ref[...].astype(jnp.float32)

    # ---- LayerNorm 1 over the full sequence (K/V need every token) ----
    x_full = x_ref[0].astype(jnp.float32)              # (S, E)
    xn_full = _layer_norm(x_full, g1, be1)

    # Query-tile rows of x / LN1(x) (static choice: q_tile, S are Python ints).
    if q_tile == S:
        x_q = x_full
        xn_q = xn_full
    else:
        q_start = pl.multiple_of(pl.program_id(1) * q_tile, q_tile)
        x_q = x_ref[0, pl.ds(q_start, q_tile), :].astype(jnp.float32)
        # Recompute LN on the tile rows (cheap) instead of dynamically slicing
        # a live (S, E) value along sublanes.
        xn_q = _layer_norm(x_q, g1, be1)

    # ---- Fused projections: wide, lane-dense MXU matmuls, biases added once ---
    kv = jnp.dot(xn_full.astype(cdt), wkv_ref[...],
                 preferred_element_type=jnp.float32)
    kv = kv + bkv_ref[...].astype(jnp.float32)         # (S, 2E) = [K | V]
    qp = jnp.dot(xn_q.astype(cdt), wq_ref[...],
                 preferred_element_type=jnp.float32)
    qp = (qp + bq_ref[...].astype(jnp.float32)) * scale  # scale folded into Q

    # ---- Per-head attention; heads land in a lane-contiguous VMEM scratch ----
    for h in range(H):                 # static unroll; per-iteration live set is small
        qh = qp[:, h * Dh:(h + 1) * Dh].astype(cdt)            # (TQ, Dh)
        kh = kv[:, h * Dh:(h + 1) * Dh].astype(cdt)            # (S,  Dh)
        vh = kv[:, E + h * Dh:E + (h + 1) * Dh].astype(cdt)    # (S,  Dh)
        s = lax.dot_general(qh, kh, (((1,), (1,)), ((), ())),
                            preferred_element_type=jnp.float32)  # (TQ, S)
        s = s - jnp.max(s, axis=-1, keepdims=True)
        p = jnp.exp(s)
        inv = pl.reciprocal(jnp.sum(p, axis=-1, keepdims=True),
                            approx=not exact_recip)
        ctx_ref[:, h * Dh:(h + 1) * Dh] = inv * jnp.dot(
            p.astype(cdt), vh, preferred_element_type=jnp.float32)

    # ---- Output projection: ONE (TQ,E)@(E,E) matmul over all heads ----
    attn = jnp.dot(ctx_ref[...].astype(cdt), wo_ref[...],
                   preferred_element_type=jnp.float32)
    attn = attn + bo_ref[...].astype(jnp.float32)
    x1 = x_q + attn                                     # residual 1 (f32)

    # ---- LayerNorm 2 + FFN + residual (fused epilogue) ----
    xn2 = _layer_norm(x1, g2_ref[...].astype(jnp.float32),
                      be2_ref[...].astype(jnp.float32))
    hdn = jnp.dot(xn2.astype(cdt), w1_ref[...],
                  preferred_element_type=jnp.float32)
    hdn = jnp.maximum(hdn + b1_ref[...].astype(jnp.float32), 0.0)   # ReLU
    y = jnp.dot(hdn.astype(cdt), w2_ref[...],
                preferred_element_type=jnp.float32)
    y = y + b2_ref[...].astype(jnp.float32)
    o_ref[0] = (x1 + y).astype(o_ref.dtype)


def transformer_block(x, params, *, num_heads, q_tile=None):
    """x: (batch, seq, embed_dim) -> (batch, seq, embed_dim)."""
    (g1, be1, wq, bq, wkv, bkv, wo, bo, g2, be2, w1, b1, w2, b2) = params
    B, S, E = x.shape
    H = num_heads
    F_ = w1.shape[1]
    assert E % H == 0
    assert wq.shape == (E, E) and wkv.shape == (E, 2 * E) and wo.shape == (E, E)
    assert w1.shape == (E, F_) and w2.shape == (F_, E)

    if q_tile is None:
        q_tile = S
    q_tile = min(q_tile, S)
    if S % q_tile != 0 or (q_tile % 8 != 0 and q_tile != S):
        q_tile = S                      # fall back to a single tile
    nq = S // q_tile

    # Advisory cost estimate so XLA schedules neighbouring ops around us.
    flops_step = (2 * S * E * 2 * E        # fused K/V projection
                  + 2 * q_tile * E * E     # Q projection (tile rows only)
                  + 4 * q_tile * S * E     # scores + probs@V over all heads
                  + 2 * q_tile * E * E     # output projection
                  + 4 * q_tile * E * F_)   # FFN
    param_bytes = sum(int(p.size) * p.dtype.itemsize for p in params)
    cost = pl.CostEstimate(
        flops=int(B * nq * flops_step),
        transcendentals=int(B * nq * (H * q_tile * S + H * q_tile + 4 * q_tile)),
        bytes_accessed=int((B * nq * S * E + B * S * E) * x.dtype.itemsize
                           + param_bytes),
    )

    # VMEM budget from actual buffer arithmetic (double-buffered blocks +
    # f32 intermediates + margin), clamped to ~3/4 of the chip's VMEM.
    block_bytes = (S * E + q_tile * E) * x.dtype.itemsize
    inter_bytes = (3 * S * E + q_tile * S + q_tile * F_ + 6 * q_tile * E) * 4
    needed = 2 * (param_bytes + block_bytes) + inter_bytes + (8 << 20)
    try:
        vmem_cap = int(pltpu.get_tpu_info().vmem_capacity_bytes)
    except Exception:
        vmem_cap = 64 * 1024 * 1024
    vmem_limit = int(min(max(needed, 32 * 1024 * 1024), (vmem_cap * 3) // 4))

    kernel = functools.partial(_transformer_block_kernel, H, q_tile)
    x_map = lambda b, qi: (b, 0, 0)
    w_map = lambda b, qi: (0, 0)        # grid-invariant -> weights stay resident
    o_map = lambda b, qi: (b, qi, 0)

    return pl.pallas_call(
        kernel,
        out_shape=jax.ShapeDtypeStruct((B, S, E), x.dtype),
        grid=(B, nq),
        in_specs=[
            pl.BlockSpec((1, S, E), x_map),       # x (full sequence: K/V need it)
            pl.BlockSpec((1, E), w_map),          # ln1 gamma
            pl.BlockSpec((1, E), w_map),          # ln1 beta
            pl.BlockSpec((E, E), w_map),          # Wq  (fused over heads)
            pl.BlockSpec((1, E), w_map),          # bq
            pl.BlockSpec((E, 2 * E), w_map),      # Wkv (fused K|V over heads)
            pl.BlockSpec((1, 2 * E), w_map),      # bkv
            pl.BlockSpec((E, E), w_map),          # Wo
            pl.BlockSpec((1, E), w_map),          # bo
            pl.BlockSpec((1, E), w_map),          # ln2 gamma
            pl.BlockSpec((1, E), w_map),          # ln2 beta
            pl.BlockSpec((E, F_), w_map),         # ffn W1
            pl.BlockSpec((1, F_), w_map),         # ffn b1
            pl.BlockSpec((F_, E), w_map),         # ffn W2
            pl.BlockSpec((1, E), w_map),          # ffn b2
        ],
        out_specs=pl.BlockSpec((1, q_tile, E), o_map),
        scratch_shapes=[pltpu.VMEM((q_tile, E), jnp.float32)],  # per-head ctx slab
        compiler_params=pltpu.CompilerParams(
            dimension_semantics=("parallel", "parallel"),
            vmem_limit_bytes=vmem_limit,
        ),
        cost_estimate=cost,
    )(x, g1, be1, wq, bq, wkv, bkv, wo, bo, g2, be2, w1, b1, w2, b2)


def init_transformer_block_params(key, embed_dim, num_heads, ff_dim,
                                  dtype=jnp.float32):
    """nn.Linear-style U(-1/sqrt(fan_in), 1/sqrt(fan_in)) init, packed for the kernel."""
    H = num_heads
    Dh = embed_dim // H
    ks = jax.random.split(key, 12)

    def lin(kw, kb, fan_in, w_shape, b_shape):
        bound = 1.0 / math.sqrt(fan_in)
        w = jax.random.uniform(kw, w_shape, jnp.float32, -bound, bound)
        b = jax.random.uniform(kb, b_shape, jnp.float32, -bound, bound)
        return w.astype(dtype), b.astype(dtype)

    # Per-head Linear(E, Dh) weights for Q/K/V, packed head-major along the
    # output axis so the kernel can take static per-head lane slices.
    wq_h, bq_h = lin(ks[0], ks[1], embed_dim, (H, embed_dim, Dh), (H, Dh))
    wk_h, bk_h = lin(ks[2], ks[3], embed_dim, (H, embed_dim, Dh), (H, Dh))
    wv_h, bv_h = lin(ks[4], ks[5], embed_dim, (H, embed_dim, Dh), (H, Dh))
    wq = jnp.moveaxis(wq_h, 0, 1).reshape(embed_dim, embed_dim)      # (E, E)
    wk = jnp.moveaxis(wk_h, 0, 1).reshape(embed_dim, embed_dim)
    wv = jnp.moveaxis(wv_h, 0, 1).reshape(embed_dim, embed_dim)
    wkv = jnp.concatenate([wk, wv], axis=1)                          # (E, 2E)
    bq = bq_h.reshape(1, embed_dim)
    bkv = jnp.concatenate([bk_h.reshape(1, embed_dim),
                           bv_h.reshape(1, embed_dim)], axis=1)      # (1, 2E)
    # fc over concatenated heads, (in, out) layout.
    wo, bo = lin(ks[6], ks[7], embed_dim, (embed_dim, embed_dim), (1, embed_dim))
    # FFN, (in, out) layout.
    w1, b1 = lin(ks[8], ks[9], embed_dim, (embed_dim, ff_dim), (1, ff_dim))
    w2, b2 = lin(ks[10], ks[11], ff_dim, (ff_dim, embed_dim), (1, embed_dim))
    # LayerNorm affine params (PyTorch default: gamma=1, beta=0).
    g1 = jnp.ones((1, embed_dim), dtype)
    be1 = jnp.zeros((1, embed_dim), dtype)
    g2 = jnp.ones((1, embed_dim), dtype)
    be2 = jnp.zeros((1, embed_dim), dtype)
    return (g1, be1, wq, bq, wkv, bkv, wo, bo, g2, be2, w1, b1, w2, b2)


def transformer_block_ref(x, params, *, num_heads):
    """Pure-JAX reference matching the PyTorch TransformerBlock forward."""
    (g1, be1, wq, bq, wkv, bkv, wo, bo, g2, be2, w1, b1, w2, b2) = params
    E = x.shape[-1]
    H = num_heads
    Dh = E // H
    f32 = jnp.float32
    hp = lax.Precision.HIGHEST

    def ln(z, g, b):
        mu = jnp.mean(z, axis=-1, keepdims=True)
        var = jnp.mean((z - mu) ** 2, axis=-1, keepdims=True)
        return (z - mu) / jnp.sqrt(var + _LN_EPS) * g.astype(f32) + b.astype(f32)

    xf = x.astype(f32)
    xn = ln(xf, g1, be1)
    q = jnp.einsum("bse,ef->bsf", xn, wq.astype(f32), precision=hp) + bq.astype(f32)
    kv = jnp.einsum("bse,ef->bsf", xn, wkv.astype(f32), precision=hp) + bkv.astype(f32)
    heads = []
    for h in range(H):
        qh = q[..., h * Dh:(h + 1) * Dh]
        kh = kv[..., h * Dh:(h + 1) * Dh]
        vh = kv[..., E + h * Dh:E + (h + 1) * Dh]
        s = jnp.einsum("bqd,bkd->bqk", qh, kh, precision=hp) / math.sqrt(Dh)
        s = s / Dh ** 0.5          # the module divides by sqrt(d) a second time
        w = jax.nn.softmax(s, axis=-1)
        heads.append(jnp.einsum("bqk,bkd->bqd", w, vh, precision=hp))
    cat = jnp.concatenate(heads, axis=-1)
    attn = jnp.einsum("bse,ef->bsf", cat, wo.astype(f32), precision=hp) + bo.astype(f32)
    x1 = xf + attn
    xn2 = ln(x1, g2, be2)
    hdn = jnp.maximum(
        jnp.einsum("bse,ef->bsf", xn2, w1.astype(f32), precision=hp) + b1.astype(f32),
        0.0)
    y = jnp.einsum("bsf,fe->bse", hdn, w2.astype(f32), precision=hp) + b2.astype(f32)
    return x1 + y


if __name__ == "__main__":
    batch, seq, embed_dim, num_heads, ff_dim = 2, 16, 128, 4, 256

    key = jax.random.PRNGKey(0)
    kx, kp = jax.random.split(key)
    x = jax.random.normal(kx, (batch, seq, embed_dim), dtype=jnp.float32)
    params = init_transformer_block_params(kp, embed_dim, num_heads, ff_dim)

    # f32 run, exercising the 2-axis grid (batch=2, 2 query tiles of 8 rows).
    out = jax.block_until_ready(
        transformer_block(x, params, num_heads=num_heads, q_tile=8))
    ref = transformer_block_ref(x, params, num_heads=num_heads)
    assert out.shape == (batch, seq, embed_dim)
    err = float(jnp.max(jnp.abs(out - ref)))
    assert jnp.allclose(out, ref, atol=1e-3, rtol=1e-3), f"f32 max_err={err}"

    # bf16 run: bf16 MXU operands, f32 stats/accumulation, approx reciprocal.
    xb = x.astype(jnp.bfloat16)
    pb = tuple(p.astype(jnp.bfloat16) for p in params)
    out_b = jax.block_until_ready(
        transformer_block(xb, pb, num_heads=num_heads, q_tile=8))
    ref_b = transformer_block_ref(xb.astype(jnp.float32),
                                  tuple(p.astype(jnp.float32) for p in pb),
                                  num_heads=num_heads)
    err_b = float(jnp.max(jnp.abs(out_b.astype(jnp.float32) - ref_b)))
    assert jnp.allclose(out_b.astype(jnp.float32), ref_b,
                        atol=7e-2, rtol=7e-2), f"bf16 max_err={err_b}"

    print("KERNEL_OK")
</pallas_src>

<mosaic_0001>
module attributes {stable_mosaic.version = 11 : i64} {
  func.func @_transformer_block_kernel(%arg0: i32, %arg1: i32, %arg2: memref<1x16x128xf32, #tpu.memory_space<vmem>>, %arg3: memref<1x128xf32, #tpu.memory_space<vmem>>, %arg4: memref<1x128xf32, #tpu.memory_space<vmem>>, %arg5: memref<128x128xf32, #tpu.memory_space<vmem>>, %arg6: memref<1x128xf32, #tpu.memory_space<vmem>>, %arg7: memref<128x256xf32, #tpu.memory_space<vmem>>, %arg8: memref<1x256xf32, #tpu.memory_space<vmem>>, %arg9: memref<128x128xf32, #tpu.memory_space<vmem>>, %arg10: memref<1x128xf32, #tpu.memory_space<vmem>>, %arg11: memref<1x128xf32, #tpu.memory_space<vmem>>, %arg12: memref<1x128xf32, #tpu.memory_space<vmem>>, %arg13: memref<128x256xf32, #tpu.memory_space<vmem>>, %arg14: memref<1x256xf32, #tpu.memory_space<vmem>>, %arg15: memref<256x128xf32, #tpu.memory_space<vmem>>, %arg16: memref<1x128xf32, #tpu.memory_space<vmem>>, %arg17: memref<1x8x128xf32, #tpu.memory_space<vmem>>, %arg18: memref<8x128xf32, #tpu.memory_space<vmem>>) attributes {dimension_semantics = [#tpu.dimension_semantics<parallel>, #tpu.dimension_semantics<parallel>], iteration_bounds = array<i64: 2, 2>, scalar_prefetch = 0 : i64, scratch_operands = 1 : i64, tpu.core_type = #tpu.core_type<tc>, window_params = [{transform_indices = @transform_0, window_bounds = array<i64: 1, 16, 128>}, {pipeline_mode = #tpu.pipeline_mode<synchronous>, transform_indices = @transform_1, window_bounds = array<i64: 1, 128>}, {pipeline_mode = #tpu.pipeline_mode<synchronous>, transform_indices = @transform_2, window_bounds = array<i64: 1, 128>}, {pipeline_mode = #tpu.pipeline_mode<synchronous>, transform_indices = @transform_3, window_bounds = array<i64: 128, 128>}, {pipeline_mode = #tpu.pipeline_mode<synchronous>, transform_indices = @transform_4, window_bounds = array<i64: 1, 128>}, {pipeline_mode = #tpu.pipeline_mode<synchronous>, transform_indices = @transform_5, window_bounds = array<i64: 128, 256>}, {pipeline_mode = #tpu.pipeline_mode<synchronous>, transform_indices = @transform_6, window_bounds = array<i64: 1, 256>}, {pipeline_mode = #tpu.pipeline_mode<synchronous>, transform_indices = @transform_7, window_bounds = array<i64: 128, 128>}, {pipeline_mode = #tpu.pipeline_mode<synchronous>, transform_indices = @transform_8, window_bounds = array<i64: 1, 128>}, {pipeline_mode = #tpu.pipeline_mode<synchronous>, transform_indices = @transform_9, window_bounds = array<i64: 1, 128>}, {pipeline_mode = #tpu.pipeline_mode<synchronous>, transform_indices = @transform_10, window_bounds = array<i64: 1, 128>}, {pipeline_mode = #tpu.pipeline_mode<synchronous>, transform_indices = @transform_11, window_bounds = array<i64: 128, 256>}, {pipeline_mode = #tpu.pipeline_mode<synchronous>, transform_indices = @transform_12, window_bounds = array<i64: 1, 256>}, {pipeline_mode = #tpu.pipeline_mode<synchronous>, transform_indices = @transform_13, window_bounds = array<i64: 256, 128>}, {pipeline_mode = #tpu.pipeline_mode<synchronous>, transform_indices = @transform_14, window_bounds = array<i64: 1, 128>}, {transform_indices = @transform_15, window_bounds = array<i64: 1, 8, 128>}]} {
    %c0 = arith.constant 0 : index
    %c0_0 = arith.constant 0 : index
    %0 = vector.load %arg3[%c0, %c0_0] : memref<1x128xf32, #tpu.memory_space<vmem>>, vector<1x128xf32>
    %c0_1 = arith.constant 0 : index
    %c0_2 = arith.constant 0 : index
    %1 = vector.load %arg4[%c0_1, %c0_2] : memref<1x128xf32, #tpu.memory_space<vmem>>, vector<1x128xf32>
    %c0_3 = arith.constant 0 : index
    %c0_4 = arith.constant 0 : index
    %c0_5 = arith.constant 0 : index
    %2 = vector.load %arg2[%c0_3, %c0_4, %c0_5] : memref<1x16x128xf32, #tpu.memory_space<vmem>>, vector<1x16x128xf32>
    %3 = vector.shape_cast %2 : vector<1x16x128xf32> to vector<16x128xf32>
    %cst = arith.constant dense<0.000000e+00> : vector<16xf32>
    %4 = vector.multi_reduction <add>, %3, %cst [1] : vector<16x128xf32> to vector<16xf32>
    %5 = vector.shape_cast %4 : vector<16xf32> to vector<16x1xf32>
    %cst_6 = arith.constant 1.280000e+02 : f32
    %6 = vector.broadcast %cst_6 : f32 to vector<16x1xf32>
    %7 = arith.divf %5, %6 : vector<16x1xf32>
    %8 = vector.broadcast %7 : vector<16x1xf32> to vector<16x128xf32>
    %9 = arith.subf %3, %8 : vector<16x128xf32>
    %10 = arith.mulf %9, %9 : vector<16x128xf32>
    %cst_7 = arith.constant dense<0.000000e+00> : vector<16xf32>
    %11 = vector.multi_reduction <add>, %10, %cst_7 [1] : vector<16x128xf32> to vector<16xf32>
    %12 = vector.shape_cast %11 : vector<16xf32> to vector<16x1xf32>
    %cst_8 = arith.constant 1.280000e+02 : f32
    %13 = vector.broadcast %cst_8 : f32 to vector<16x1xf32>
    %14 = arith.divf %12, %13 : vector<16x1xf32>
    %cst_9 = arith.constant 9.99999974E-6 : f32
    %15 = vector.broadcast %cst_9 : f32 to vector<16x1xf32>
    %16 = arith.addf %14, %15 : vector<16x1xf32>
    %17 = math.rsqrt %16 : vector<16x1xf32>
    %18 = vector.broadcast %17 : vector<16x1xf32> to vector<16x128xf32>
    %19 = arith.mulf %9, %18 : vector<16x128xf32>
    %20 = vector.broadcast %0 : vector<1x128xf32> to vector<16x128xf32>
    %21 = arith.mulf %19, %20 : vector<16x128xf32>
    %22 = vector.broadcast %1 : vector<1x128xf32> to vector<16x128xf32>
    %23 = arith.addf %21, %22 : vector<16x128xf32>
    %c8_i32 = arith.constant 8 : i32
    %24 = arith.muli %arg1, %c8_i32 : i32
    %25 = tpu.assume_multiple %24, 8 : i32
    %c0_10 = arith.constant 0 : index
    %26 = arith.index_cast %25 : i32 to index
    %c0_11 = arith.constant 0 : index
    %27 = vector.load %arg2[%c0_10, %26, %c0_11] : memref<1x16x128xf32, #tpu.memory_space<vmem>>, vector<1x8x128xf32>
    %28 = vector.shape_cast %27 : vector<1x8x128xf32> to vector<8x128xf32>
    %cst_12 = arith.constant dense<0.000000e+00> : vector<8xf32>
    %29 = vector.multi_reduction <add>, %28, %cst_12 [1] : vector<8x128xf32> to vector<8xf32>
    %30 = vector.shape_cast %29 : vector<8xf32> to vector<8x1xf32>
    %cst_13 = arith.constant 1.280000e+02 : f32
    %31 = vector.broadcast %cst_13 : f32 to vector<8x1xf32>
    %32 = arith.divf %30, %31 : vector<8x1xf32>
    %33 = vector.broadcast %32 : vector<8x1xf32> to vector<8x128xf32>
    %34 = arith.subf %28, %33 : vector<8x128xf32>
    %35 = arith.mulf %34, %34 : vector<8x128xf32>
    %cst_14 = arith.constant dense<0.000000e+00> : vector<8xf32>
    %36 = vector.multi_reduction <add>, %35, %cst_14 [1] : vector<8x128xf32> to vector<8xf32>
    %37 = vector.shape_cast %36 : vector<8xf32> to vector<8x1xf32>
    %cst_15 = arith.constant 1.280000e+02 : f32
    %38 = vector.broadcast %cst_15 : f32 to vector<8x1xf32>
    %39 = arith.divf %37, %38 : vector<8x1xf32>
    %cst_16 = arith.constant 9.99999974E-6 : f32
    %40 = vector.broadcast %cst_16 : f32 to vector<8x1xf32>
    %41 = arith.addf %39, %40 : vector<8x1xf32>
    %42 = math.rsqrt %41 : vector<8x1xf32>
    %43 = vector.broadcast %42 : vector<8x1xf32> to vector<8x128xf32>
    %44 = arith.mulf %34, %43 : vector<8x128xf32>
    %45 = vector.broadcast %0 : vector<1x128xf32> to vector<8x128xf32>
    %46 = arith.mulf %44, %45 : vector<8x128xf32>
    %47 = vector.broadcast %1 : vector<1x128xf32> to vector<8x128xf32>
    %48 = arith.addf %46, %47 : vector<8x128xf32>
    %c0_17 = arith.constant 0 : index
    %c0_18 = arith.constant 0 : index
    %49 = vector.load %arg7[%c0_17, %c0_18] : memref<128x256xf32, #tpu.memory_space<vmem>>, vector<128x256xf32>
    %cst_19 = arith.constant dense<0.000000e+00> : vector<16x256xf32>
    %50 = tpu.matmul %23, %49, %cst_19 {dimension_numbers = #tpu.dot_dimension_numbers<[1], [0], [0], [1], [0, 0, 1, 1], [], []>} : vector<16x128xf32>, vector<128x256xf32>, vector<16x256xf32> -> vector<16x256xf32>
    %c0_20 = arith.constant 0 : index
    %c0_21 = arith.constant 0 : index
    %51 = vector.load %arg8[%c0_20, %c0_21] : memref<1x256xf32, #tpu.memory_space<vmem>>, vector<1x256xf32>
    %52 = vector.broadcast %51 : vector<1x256xf32> to vector<16x256xf32>
    %53 = arith.addf %50, %52 : vector<16x256xf32>
    %c0_22 = arith.constant 0 : index
    %c0_23 = arith.constant 0 : index
    %54 = vector.load %arg5[%c0_22, %c0_23] : memref<128x128xf32, #tpu.memory_space<vmem>>, vector<128x128xf32>
    %cst_24 = arith.constant dense<0.000000e+00> : vector<8x128xf32>
    %55 = tpu.matmul %48, %54, %cst_24 {dimension_numbers = #tpu.dot_dimension_numbers<[1], [0], [0], [1], [0, 0, 1, 1], [], []>} : vector<8x128xf32>, vector<128x128xf32>, vector<8x128xf32> -> vector<8x128xf32>
    %c0_25 = arith.constant 0 : index
    %c0_26 = arith.constant 0 : index
    %56 = vector.load %arg6[%c0_25, %c0_26] : memref<1x128xf32, #tpu.memory_space<vmem>>, vector<1x128xf32>
    %57 = vector.broadcast %56 : vector<1x128xf32> to vector<8x128xf32>
    %58 = arith.addf %55, %57 : vector<8x128xf32>
    %cst_27 = arith.constant 3.125000e-02 : f32
    %59 = vector.broadcast %cst_27 : f32 to vector<8x128xf32>
    %60 = arith.mulf %58, %59 : vector<8x128xf32>
    %61 = vector.extract_strided_slice %60 {offsets = [0, 0], sizes = [8, 32], strides = [1, 1]} : vector<8x128xf32> to vector<8x32xf32>
    %62 = vector.extract_strided_slice %53 {offsets = [0, 0], sizes = [16, 32], strides = [1, 1]} : vector<16x256xf32> to vector<16x32xf32>
    %63 = vector.extract_strided_slice %53 {offsets = [0, 128], sizes = [16, 32], strides = [1, 1]} : vector<16x256xf32> to vector<16x32xf32>
    %cst_28 = arith.constant dense<0.000000e+00> : vector<8x16xf32>
    %64 = tpu.matmul %61, %62, %cst_28 {dimension_numbers = #tpu.dot_dimension_numbers<[1], [1], [0], [0], [0, 0, 1, 0], [], []>} : vector<8x32xf32>, vector<16x32xf32>, vector<8x16xf32> -> vector<8x16xf32>
    %cst_29 = arith.constant dense<0xFF800000> : vector<8xf32>
    %65 = vector.multi_reduction <maximumf>, %64, %cst_29 [1] : vector<8x16xf32> to vector<8xf32>
    %66 = vector.shape_cast %65 : vector<8xf32> to vector<8x1xf32>
    %67 = vector.broadcast %66 : vector<8x1xf32> to vector<8x16xf32>
    %68 = arith.subf %64, %67 : vector<8x16xf32>
    %69 = math.exp %68 : vector<8x16xf32>
    %cst_30 = arith.constant dense<0.000000e+00> : vector<8xf32>
    %70 = vector.multi_reduction <add>, %69, %cst_30 [1] : vector<8x16xf32> to vector<8xf32>
    %71 = vector.shape_cast %70 : vector<8xf32> to vector<8x1xf32>
    %72 = tpu.reciprocal %71 : vector<8x1xf32> -> vector<8x1xf32>
    %cst_31 = arith.constant dense<0.000000e+00> : vector<8x32xf32>
    %73 = tpu.matmul %69, %63, %cst_31 {dimension_numbers = #tpu.dot_dimension_numbers<[1], [0], [0], [1], [0, 0, 1, 1], [], []>} : vector<8x16xf32>, vector<16x32xf32>, vector<8x32xf32> -> vector<8x32xf32>
    %74 = vector.broadcast %72 : vector<8x1xf32> to vector<8x32xf32>
    %75 = arith.mulf %74, %73 : vector<8x32xf32>
    %c0_32 = arith.constant 0 : index
    %c0_33 = arith.constant 0 : index
    %76 = vector.load %arg18[%c0_32, %c0_33] : memref<8x128xf32, #tpu.memory_space<vmem>>, vector<8x32xf32>
    tpu.vector_store %arg18[%c0_32, %c0_33], %75 {strides = array<i32>} : memref<8x128xf32, #tpu.memory_space<vmem>>, vector<8x32xf32>,
    %77 = vector.extract_strided_slice %60 {offsets = [0, 32], sizes = [8, 32], strides = [1, 1]} : vector<8x128xf32> to vector<8x32xf32>
    %78 = vector.extract_strided_slice %53 {offsets = [0, 32], sizes = [16, 32], strides = [1, 1]} : vector<16x256xf32> to vector<16x32xf32>
    %79 = vector.extract_strided_slice %53 {offsets = [0, 160], sizes = [16, 32], strides = [1, 1]} : vector<16x256xf32> to vector<16x32xf32>
    %cst_34 = arith.constant dense<0.000000e+00> : vector<8x16xf32>
    %80 = tpu.matmul %77, %78, %cst_34 {dimension_numbers = #tpu.dot_dimension_numbers<[1], [1], [0], [0], [0, 0, 1, 0], [], []>} : vector<8x32xf32>, vector<16x32xf32>, vector<8x16xf32> -> vector<8x16xf32>
    %cst_35 = arith.constant dense<0xFF800000> : vector<8xf32>
    %81 = vector.multi_reduction <maximumf>, %80, %cst_35 [1] : vector<8x16xf32> to vector<8xf32>
    %82 = vector.shape_cast %81 : vector<8xf32> to vector<8x1xf32>
    %83 = vector.broadcast %82 : vector<8x1xf32> to vector<8x16xf32>
    %84 = arith.subf %80, %83 : vector<8x16xf32>
    %85 = math.exp %84 : vector<8x16xf32>
    %cst_36 = arith.constant dense<0.000000e+00> : vector<8xf32>
    %86 = vector.multi_reduction <add>, %85, %cst_36 [1] : vector<8x16xf32> to vector<8xf32>
    %87 = vector.shape_cast %86 : vector<8xf32> to vector<8x1xf32>
    %88 = tpu.reciprocal %87 : vector<8x1xf32> -> vector<8x1xf32>
    %cst_37 = arith.constant dense<0.000000e+00> : vector<8x32xf32>
    %89 = tpu.matmul %85, %79, %cst_37 {dimension_numbers = #tpu.dot_dimension_numbers<[1], [0], [0], [1], [0, 0, 1, 1], [], []>} : vector<8x16xf32>, vector<16x32xf32>, vector<8x32xf32> -> vector<8x32xf32>
    %90 = vector.broadcast %88 : vector<8x1xf32> to vector<8x32xf32>
    %91 = arith.mulf %90, %89 : vector<8x32xf32>
    %c0_38 = arith.constant 0 : index
    %c32 = arith.constant 32 : index
    %92 = vector.load %arg18[%c0_38, %c32] : memref<8x128xf32, #tpu.memory_space<vmem>>, vector<8x32xf32>
    tpu.vector_store %arg18[%c0_38, %c32], %91 {strides = array<i32>} : memref<8x128xf32, #tpu.memory_space<vmem>>, vector<8x32xf32>,
    %93 = vector.extract_strided_slice %60 {offsets = [0, 64], sizes = [8, 32], strides = [1, 1]} : vector<8x128xf32> to vector<8x32xf32>
    %94 = vector.extract_strided_slice %53 {offsets = [0, 64], sizes = [16, 32], strides = [1, 1]} : vector<16x256xf32> to vector<16x32xf32>
    %95 = vector.extract_strided_slice %53 {offsets = [0, 192], sizes = [16, 32], strides = [1, 1]} : vector<16x256xf32> to vector<16x32xf32>
    %cst_39 = arith.constant dense<0.000000e+00> : vector<8x16xf32>
    %96 = tpu.matmul %93, %94, %cst_39 {dimension_numbers = #tpu.dot_dimension_numbers<[1], [1], [0], [0], [0, 0, 1, 0], [], []>} : vector<8x32xf32>, vector<16x32xf32>, vector<8x16xf32> -> vector<8x16xf32>
    %cst_40 = arith.constant dense<0xFF800000> : vector<8xf32>
    %97 = vector.multi_reduction <maximumf>, %96, %cst_40 [1] : vector<8x16xf32> to vector<8xf32>
    %98 = vector.shape_cast %97 : vector<8xf32> to vector<8x1xf32>
    %99 = vector.broadcast %98 : vector<8x1xf32> to vector<8x16xf32>
    %100 = arith.subf %96, %99 : vector<8x16xf32>
    %101 = math.exp %100 : vector<8x16xf32>
    %cst_41 = arith.constant dense<0.000000e+00> : vector<8xf32>
    %102 = vector.multi_reduction <add>, %101, %cst_41 [1] : vector<8x16xf32> to vector<8xf32>
    %103 = vector.shape_cast %102 : vector<8xf32> to vector<8x1xf32>
    %104 = tpu.reciprocal %103 : vector<8x1xf32> -> vector<8x1xf32>
    %cst_42 = arith.constant dense<0.000000e+00> : vector<8x32xf32>
    %105 = tpu.matmul %101, %95, %cst_42 {dimension_numbers = #tpu.dot_dimension_numbers<[1], [0], [0], [1], [0, 0, 1, 1], [], []>} : vector<8x16xf32>, vector<16x32xf32>, vector<8x32xf32> -> vector<8x32xf32>
    %106 = vector.broadcast %104 : vector<8x1xf32> to vector<8x32xf32>
    %107 = arith.mulf %106, %105 : vector<8x32xf32>
    %c0_43 = arith.constant 0 : index
    %c64 = arith.constant 64 : index
    %108 = vector.load %arg18[%c0_43, %c64] : memref<8x128xf32, #tpu.memory_space<vmem>>, vector<8x32xf32>
    tpu.vector_store %arg18[%c0_43, %c64], %107 {strides = array<i32>} : memref<8x128xf32, #tpu.memory_space<vmem>>, vector<8x32xf32>,
    %109 = vector.extract_strided_slice %60 {offsets = [0, 96], sizes = [8, 32], strides = [1, 1]} : vector<8x128xf32> to vector<8x32xf32>
    %110 = vector.extract_strided_slice %53 {offsets = [0, 96], sizes = [16, 32], strides = [1, 1]} : vector<16x256xf32> to vector<16x32xf32>
    %111 = vector.extract_strided_slice %53 {offsets = [0, 224], sizes = [16, 32], strides = [1, 1]} : vector<16x256xf32> to vector<16x32xf32>
    %cst_44 = arith.constant dense<0.000000e+00> : vector<8x16xf32>
    %112 = tpu.matmul %109, %110, %cst_44 {dimension_numbers = #tpu.dot_dimension_numbers<[1], [1], [0], [0], [0, 0, 1, 0], [], []>} : vector<8x32xf32>, vector<16x32xf32>, vector<8x16xf32> -> vector<8x16xf32>
    %cst_45 = arith.constant dense<0xFF800000> : vector<8xf32>
    %113 = vector.multi_reduction <maximumf>, %112, %cst_45 [1] : vector<8x16xf32> to vector<8xf32>
    %114 = vector.shape_cast %113 : vector<8xf32> to vector<8x1xf32>
    %115 = vector.broadcast %114 : vector<8x1xf32> to vector<8x16xf32>
    %116 = arith.subf %112, %115 : vector<8x16xf32>
    %117 = math.exp %116 : vector<8x16xf32>
    %cst_46 = arith.constant dense<0.000000e+00> : vector<8xf32>
    %118 = vector.multi_reduction <add>, %117, %cst_46 [1] : vector<8x16xf32> to vector<8xf32>
    %119 = vector.shape_cast %118 : vector<8xf32> to vector<8x1xf32>
    %120 = tpu.reciprocal %119 : vector<8x1xf32> -> vector<8x1xf32>
    %cst_47 = arith.constant dense<0.000000e+00> : vector<8x32xf32>
    %121 = tpu.matmul %117, %111, %cst_47 {dimension_numbers = #tpu.dot_dimension_numbers<[1], [0], [0], [1], [0, 0, 1, 1], [], []>} : vector<8x16xf32>, vector<16x32xf32>, vector<8x32xf32> -> vector<8x32xf32>
    %122 = vector.broadcast %120 : vector<8x1xf32> to vector<8x32xf32>
    %123 = arith.mulf %122, %121 : vector<8x32xf32>
    %c0_48 = arith.constant 0 : index
    %c96 = arith.constant 96 : index
    %124 = vector.load %arg18[%c0_48, %c96] : memref<8x128xf32, #tpu.memory_space<vmem>>, vector<8x32xf32>
    tpu.vector_store %arg18[%c0_48, %c96], %123 {strides = array<i32>} : memref<8x128xf32, #tpu.memory_space<vmem>>, vector<8x32xf32>,
    %c0_49 = arith.constant 0 : index
    %c0_50 = arith.constant 0 : index
    %125 = vector.load %arg18[%c0_49, %c0_50] : memref<8x128xf32, #tpu.memory_space<vmem>>, vector<8x128xf32>
    %c0_51 = arith.constant 0 : index
    %c0_52 = arith.constant 0 : index
    %126 = vector.load %arg9[%c0_51, %c0_52] : memref<128x128xf32, #tpu.memory_space<vmem>>, vector<128x128xf32>
    %cst_53 = arith.constant dense<0.000000e+00> : vector<8x128xf32>
    %127 = tpu.matmul %125, %126, %cst_53 {dimension_numbers = #tpu.dot_dimension_numbers<[1], [0], [0], [1], [0, 0, 1, 1], [], []>} : vector<8x128xf32>, vector<128x128xf32>, vector<8x128xf32> -> vector<8x128xf32>
    %c0_54 = arith.constant 0 : index
    %c0_55 = arith.constant 0 : index
    %128 = vector.load %arg10[%c0_54, %c0_55] : memref<1x128xf32, #tpu.memory_space<vmem>>, vector<1x128xf32>
    %129 = vector.broadcast %128 : vector<1x128xf32> to vector<8x128xf32>
    %130 = arith.addf %127, %129 : vector<8x128xf32>
    %131 = arith.addf %28, %130 : vector<8x128xf32>
    %c0_56 = arith.constant 0 : index
    %c0_57 = arith.constant 0 : index
    %132 = vector.load %arg11[%c0_56, %c0_57] : memref<1x128xf32, #tpu.memory_space<vmem>>, vector<1x128xf32>
    %c0_58 = arith.constant 0 : index
    %c0_59 = arith.constant 0 : index
    %133 = vector.load %arg12[%c0_58, %c0_59] : memref<1x128xf32, #tpu.memory_space<vmem>>, vector<1x128xf32>
    %cst_60 = arith.constant dense<0.000000e+00> : vector<8xf32>
    %134 = vector.multi_reduction <add>, %131, %cst_60 [1] : vector<8x128xf32> to vector<8xf32>
    %135 = vector.shape_cast %134 : vector<8xf32> to vector<8x1xf32>
    %cst_61 = arith.constant 1.280000e+02 : f32
    %136 = vector.broadcast %cst_61 : f32 to vector<8x1xf32>
    %137 = arith.divf %135, %136 : vector<8x1xf32>
    %138 = vector.broadcast %137 : vector<8x1xf32> to vector<8x128xf32>
    %139 = arith.subf %131, %138 : vector<8x128xf32>
    %140 = arith.mulf %139, %139 : vector<8x128xf32>
    %cst_62 = arith.constant dense<0.000000e+00> : vector<8xf32>
    %141 = vector.multi_reduction <add>, %140, %cst_62 [1] : vector<8x128xf32> to vector<8xf32>
    %142 = vector.shape_cast %141 : vector<8xf32> to vector<8x1xf32>
    %cst_63 = arith.constant 1.280000e+02 : f32
    %143 = vector.broadcast %cst_63 : f32 to vector<8x1xf32>
    %144 = arith.divf %142, %143 : vector<8x1xf32>
    %cst_64 = arith.constant 9.99999974E-6 : f32
    %145 = vector.broadcast %cst_64 : f32 to vector<8x1xf32>
    %146 = arith.addf %144, %145 : vector<8x1xf32>
    %147 = math.rsqrt %146 : vector<8x1xf32>
    %148 = vector.broadcast %147 : vector<8x1xf32> to vector<8x128xf32>
    %149 = arith.mulf %139, %148 : vector<8x128xf32>
    %150 = vector.broadcast %132 : vector<1x128xf32> to vector<8x128xf32>
    %151 = arith.mulf %149, %150 : vector<8x128xf32>
    %152 = vector.broadcast %133 : vector<1x128xf32> to vector<8x128xf32>
    %153 = arith.addf %151, %152 : vector<8x128xf32>
    %c0_65 = arith.constant 0 : index
    %c0_66 = arith.constant 0 : index
    %154 = vector.load %arg13[%c0_65, %c0_66] : memref<128x256xf32, #tpu.memory_space<vmem>>, vector<128x256xf32>
    %cst_67 = arith.constant dense<0.000000e+00> : vector<8x256xf32>
    %155 = tpu.matmul %153, %154, %cst_67 {dimension_numbers = #tpu.dot_dimension_numbers<[1], [0], [0], [1], [0, 0, 1, 1], [], []>} : vector<8x128xf32>, vector<128x256xf32>, vector<8x256xf32> -> vector<8x256xf32>
    %c0_68 = arith.constant 0 : index
    %c0_69 = arith.constant 0 : index
    %156 = vector.load %arg14[%c0_68, %c0_69] : memref<1x256xf32, #tpu.memory_space<vmem>>, vector<1x256xf32>
    %157 = vector.broadcast %156 : vector<1x256xf32> to vector<8x256xf32>
    %158 = arith.addf %155, %157 : vector<8x256xf32>
    %cst_70 = arith.constant 0.000000e+00 : f32
    %159 = vector.broadcast %cst_70 : f32 to vector<8x256xf32>
    %160 = arith.maximumf %158, %159 : vector<8x256xf32>
    %c0_71 = arith.constant 0 : index
    %c0_72 = arith.constant 0 : index
    %161 = vector.load %arg15[%c0_71, %c0_72] : memref<256x128xf32, #tpu.memory_space<vmem>>, vector<256x128xf32>
    %cst_73 = arith.constant dense<0.000000e+00> : vector<8x128xf32>
    %162 = tpu.matmul %160, %161, %cst_73 {dimension_numbers = #tpu.dot_dimension_numbers<[1], [0], [0], [1], [0, 0, 1, 1], [], []>} : vector<8x256xf32>, vector<256x128xf32>, vector<8x128xf32> -> vector<8x128xf32>
    %c0_74 = arith.constant 0 : index
    %c0_75 = arith.constant 0 : index
    %163 = vector.load %arg16[%c0_74, %c0_75] : memref<1x128xf32, #tpu.memory_space<vmem>>, vector<1x128xf32>
    %164 = vector.broadcast %163 : vector<1x128xf32> to vector<8x128xf32>
    %165 = arith.addf %162, %164 : vector<8x128xf32>
    %166 = arith.addf %131, %165 : vector<8x128xf32>
    %c0_76 = arith.constant 0 : index
    %c0_77 = arith.constant 0 : index
    %c0_78 = arith.constant 0 : index
    %167 = vector.load %arg17[%c0_76, %c0_77, %c0_78] : memref<1x8x128xf32, #tpu.memory_space<vmem>>, vector<1x8x128xf32>
    %168 = vector.shape_cast %167 : vector<1x8x128xf32> to vector<8x128xf32>
    %169 = vector.shape_cast %166 : vector<8x128xf32> to vector<1x8x128xf32>
    tpu.vector_store %arg17[%c0_76, %c0_77, %c0_78], %169 {strides = array<i32>} : memref<1x8x128xf32, #tpu.memory_space<vmem>>, vector<1x8x128xf32>,
    return
  }
  func.func @transform_0(%arg0: i32, %arg1: i32) -> (i32, i32, i32) {
    %c0_i32 = arith.constant 0 : i32
    %c0_i32_0 = arith.constant 0 : i32
    %c0_i32_1 = arith.constant 0 : i32
    return %arg0, %c0_i32, %c0_i32_0 : i32, i32, i32
  }
  func.func @transform_1(%arg0: i32, %arg1: i32) -> (i32, i32) {
    %c0_i32 = arith.constant 0 : i32
    %c0_i32_0 = arith.constant 0 : i32
    %c0_i32_1 = arith.constant 0 : i32
    return %c0_i32, %c0_i32_0 : i32, i32
  }
  func.func @transform_2(%arg0: i32, %arg1: i32) -> (i32, i32) {
    %c0_i32 = arith.constant 0 : i32
    %c0_i32_0 = arith.constant 0 : i32
    %c0_i32_1 = arith.constant 0 : i32
    return %c0_i32, %c0_i32_0 : i32, i32
  }
  func.func @transform_3(%arg0: i32, %arg1: i32) -> (i32, i32) {
    %c0_i32 = arith.constant 0 : i32
    %c0_i32_0 = arith.constant 0 : i32
    %c0_i32_1 = arith.constant 0 : i32
    return %c0_i32, %c0_i32_0 : i32, i32
  }
  func.func @transform_4(%arg0: i32, %arg1: i32) -> (i32, i32) {
    %c0_i32 = arith.constant 0 : i32
    %c0_i32_0 = arith.constant 0 : i32
    %c0_i32_1 = arith.constant 0 : i32
    return %c0_i32, %c0_i32_0 : i32, i32
  }
  func.func @transform_5(%arg0: i32, %arg1: i32) -> (i32, i32) {
    %c0_i32 = arith.constant 0 : i32
    %c0_i32_0 = arith.constant 0 : i32
    %c0_i32_1 = arith.constant 0 : i32
    return %c0_i32, %c0_i32_0 : i32, i32
  }
  func.func @transform_6(%arg0: i32, %arg1: i32) -> (i32, i32) {
    %c0_i32 = arith.constant 0 : i32
    %c0_i32_0 = arith.constant 0 : i32
    %c0_i32_1 = arith.constant 0 : i32
    return %c0_i32, %c0_i32_0 : i32, i32
  }
  func.func @transform_7(%arg0: i32, %arg1: i32) -> (i32, i32) {
    %c0_i32 = arith.constant 0 : i32
    %c0_i32_0 = arith.constant 0 : i32
    %c0_i32_1 = arith.constant 0 : i32
    return %c0_i32, %c0_i32_0 : i32, i32
  }
  func.func @transform_8(%arg0: i32, %arg1: i32) -> (i32, i32) {
    %c0_i32 = arith.constant 0 : i32
    %c0_i32_0 = arith.constant 0 : i32
    %c0_i32_1 = arith.constant 0 : i32
    return %c0_i32, %c0_i32_0 : i32, i32
  }
  func.func @transform_9(%arg0: i32, %arg1: i32) -> (i32, i32) {
    %c0_i32 = arith.constant 0 : i32
    %c0_i32_0 = arith.constant 0 : i32
    %c0_i32_1 = arith.constant 0 : i32
    return %c0_i32, %c0_i32_0 : i32, i32
  }
  func.func @transform_10(%arg0: i32, %arg1: i32) -> (i32, i32) {
    %c0_i32 = arith.constant 0 : i32
    %c0_i32_0 = arith.constant 0 : i32
    %c0_i32_1 = arith.constant 0 : i32
    return %c0_i32, %c0_i32_0 : i32, i32
  }
  func.func @transform_11(%arg0: i32, %arg1: i32) -> (i32, i32) {
    %c0_i32 = arith.constant 0 : i32
    %c0_i32_0 = arith.constant 0 : i32
    %c0_i32_1 = arith.constant 0 : i32
    return %c0_i32, %c0_i32_0 : i32, i32
  }
  func.func @transform_12(%arg0: i32, %arg1: i32) -> (i32, i32) {
    %c0_i32 = arith.constant 0 : i32
    %c0_i32_0 = arith.constant 0 : i32
    %c0_i32_1 = arith.constant 0 : i32
    return %c0_i32, %c0_i32_0 : i32, i32
  }
  func.func @transform_13(%arg0: i32, %arg1: i32) -> (i32, i32) {
    %c0_i32 = arith.constant 0 : i32
    %c0_i32_0 = arith.constant 0 : i32
    %c0_i32_1 = arith.constant 0 : i32
    return %c0_i32, %c0_i32_0 : i32, i32
  }
  func.func @transform_14(%arg0: i32, %arg1: i32) -> (i32, i32) {
    %c0_i32 = arith.constant 0 : i32
    %c0_i32_0 = arith.constant 0 : i32
    %c0_i32_1 = arith.constant 0 : i32
    return %c0_i32, %c0_i32_0 : i32, i32
  }
  func.func @transform_15(%arg0: i32, %arg1: i32) -> (i32, i32, i32) {
    %c0_i32 = arith.constant 0 : i32
    %c0_i32_0 = arith.constant 0 : i32
    return %arg0, %arg1, %c0_i32 : i32, i32, i32
  }
}

</mosaic_0001>

<bundles_post_ra>
// kernel: tpu_custom_call.1
= control target key start
LH: loop header
LB: loop body
LE: loop exit
PB: predicated region body
PF: predicated region fallthrough
CT: control target
= control target key end

     0   :  { %s3459_s0 = inlined_call_operand.hbm [shape: f32[2,16,128], index: 0, kind: input, shape index: {}]   ;;  %s3460_s1 = inlined_call_operand.vmem [shape: f32[1,128], index: 1, kind: input, shape index: {}]   ;;  %s3461_s2 = inlined_call_operand.hbm [shape: f32[1,128], index: 2, kind: input, shape index: {}]   ;;  %s3462_s3 = inlined_call_operand.hbm [shape: f32[128,128], index: 3, kind: input, shape index: {}]   ;;  %s3463_s4 = inlined_call_operand.vmem [shape: f32[1,128], index: 4, kind: input, shape index: {}]   ;;  %s3464_s5 = inlined_call_operand.hbm [shape: f32[128,256], index: 5, kind: input, shape index: {}]   ;;  %s3465_s6 = inlined_call_operand.vmem [shape: f32[1,256], index: 6, kind: input, shape index: {}]   ;;  %s3466_s7 = inlined_call_operand.hbm [shape: f32[128,128], index: 7, kind: input, shape index: {}]   ;;  %s3467_s8 = inlined_call_operand.vmem [shape: f32[1,128], index: 8, kind: input, shape index: {}]   ;;  %s3468_s9 = inlined_call_operand.vmem [shape: f32[1,128], index: 9, kind: input, shape index: {}]   ;;  %s3469_s10 = inlined_call_operand.vmem [shape: f32[1,128], index: 10, kind: input, shape index: {}]   ;;  %s3470_s11 = inlined_call_operand.hbm [shape: f32[128,256], index: 11, kind: input, shape index: {}]   ;;  %s3471_s12 = inlined_call_operand.vmem [shape: f32[1,256], index: 12, kind: input, shape index: {}]   ;;  %s3472_s13 = inlined_call_operand.hbm [shape: f32[256,128], index: 13, kind: input, shape index: {}]   ;;  %s3473_s14 = inlined_call_operand.vmem [shape: f32[1,128], index: 14, kind: input, shape index: {}]   ;;  %s3474_s15 = inlined_call_operand.hbm [shape: f32[2,16,128], index: 15, kind: output, shape index: {}]  }
   0x1   :  { %3483 = sst [smem:[#allocation24_spill]] %s3460_s1 }
   0x2   :  { %3484 = sst [smem:[#allocation25_spill]] %s3461_s2 }
   0x3   :  { %3485 = sst [smem:[#allocation26_spill]] %s3462_s3 }
   0x4   :  { %3486 = sst [smem:[#allocation27_spill]] %s3463_s4 }
   0x5   :  { %3487 = sst [smem:[#allocation28_spill]] %s3464_s5 }
   0x6   :  { %3488 = sst [smem:[#allocation29_spill]] %s3465_s6 }
   0x7   :  { %3489 = sst [smem:[#allocation30_spill]] %s3466_s7 }
   0x8   :  { %3490 = sst [smem:[#allocation31_spill]] %s3467_s8 }
   0x9   :  { %3491 = sst [smem:[#allocation32_spill]] %s3468_s9 }
   0xa   :  { %3492 = sst [smem:[#allocation33_spill]] %s3469_s10 }
   0xb   :  { %3493 = sst [smem:[#allocation34_spill]] %s3470_s11 }
   0xc   :  { %3494 = sst [smem:[#allocation35_spill]] %s3471_s12 }
   0xd   :  { %3495 = sst [smem:[#allocation36_spill]] %s3472_s13 }
   0xe   :  { %3496 = sst [smem:[#allocation37_spill]] %s3473_s14 }
   0xf   :  { %3497 = sst [smem:[#allocation38_spill]] %s3474_s15 }
  0x10   :  { %20 = vsyncpa [#allocation4], 0 }
  0x11   :  { %22 = vsyncpa [#allocation4 + $0x1], 0 }
  0x12   :  { %23 = vsyncpa [#allocation7], 0 }
  0x13   :  { %24 = vsyncpa [#allocation10], 0 }
  0x14   :  { %25 = vsyncpa [#allocation13], 0 }
  0x15   :  { %26 = vsyncpa [#allocation5], 0 }
  0x16   :  { %28 = vsyncpa [#allocation5 + $0x1], 0  ;;  %s2978_s18 = smov 0   ;;  %s2980_s19 = smov 0  }
  0x17   :  { %s2982_s20 = smov 0   ;;  %s2984_s21 = smov 0  }
  0x18   :  { %s2986_s22 = smov 0   ;;  %s2988_s23 = smov 0  }
  0x19   :  { %s2990_s24 = smov 0   ;;  %s2992_s25 = smov 0  }
  0x1a   :  { %s2994_s26 = smov 0   ;;  %s2996_s27 = smov 0  }
  0x1b   :  { %s2998_s28 = smov 0  }
  0x1c LB: > { %3498 = sst [smem:[#allocation21_spill]] %s2863_s24  ;;  %s2096_s29 = sadd.s32 4294967295, %s2879_s28   ;;  %s2879_s28 = sphi %s2998_s28, %s34_s28   ;;  %s2875_s27 = sphi %s2996_s27, %s3545_s27   ;;  %s2871_s26 = sphi %s2994_s26, %s3544_s26   ;;  %s2867_s25 = sphi %s2992_s25, %s3543_s25   ;;  %s2863_s24 = sphi %s2990_s24, %s3542_s24   ;;  %s2859_s23 = sphi %s2988_s23, %s3541_s23   ;;  %s2855_s22 = sphi %s2986_s22, %s3540_s22   ;;  %s2851_s21 = sphi %s2984_s21, %s3539_s21   ;;  %s2847_s20 = sphi %s2982_s20, %s3538_s20   ;;  %s2843_s19 = sphi %s2980_s19, %s3537_s19   ;;  %s2839_s18 = sphi %s2978_s18, %s3536_s18  }
  0x1d   : > { %3499 = sst [smem:[#allocation22_spill]] %s2867_s25  ;;  %p2098_p0 = scmp.ge.s32.totalorder %s2879_s28, 1 }
  0x1e   : > { %p3035_p1 = scmp.eq.s32.totalorder %s2096_s29, 0  ;;  %p3039_p2 = scmp.eq.s32.totalorder %s2096_s29, 3 }
  0x1f   : > { %p399_p3 = scmp.lt.s32.totalorder %s2879_s28, 5  ;;  %s2881_s15 = smov [#allocation6]  }
  0x20   : > { %s3500_s30 = scalar_select %p3035_p1, 1, 0 }
  0x21   : > { %s3501_s16 = scalar_select %p3039_p2, 1, 0 }
  0x22   : > { %p3044_p4 = pnand %p2098_p0, %p399_p3  ;;  %s415_s14 = sshll.u32 %s2881_s15, 4  ;;  %s416_s14 = int_to_ptr.vmem [resolvable:$true] %s415_s14 }
  0x23   : > { %s2882_s12 = smov [#allocation9]   ;;  %s2883_s10 = smov [#allocation12]  }
  0x24   : > { %s3502_s17 = scalar_select %p3044_p4, 1, 0 }
  0x25   : > { %p2395_p5 = pneg %p3044_p4  ;;  %s441_s25 = sshll.u32 %s2882_s12, 4  ;;  %s3050_s25 = int_to_ptr.vmem [resolvable:$true] %s441_s25 }
  0x26   : > { %s479_s9 = sshll.u32 %s2883_s10, 4  ;;  %s2574_s15 = scalar_lea.vmem %s416_s14, 16  ;;  %s480_s9 = int_to_ptr.vmem [resolvable:$true] %s479_s9 }
  0x27   : > { %p3054_p6 = pnand %p2395_p5, %p3035_p1  ;;  %p2575_p8 = scmp.ne.s32.totalorder %s416_s14, %s2574_s15 }
  0x28   : > { %s2581_s12 = scalar_lea.vmem %s416_s14, 32  ;;  %p2582_p11 = scmp.lt.s32.totalorder %s416_s14, %s416_s14 }
  0x29   : > { %p3060_p7 = pneg %p3054_p6  ;;  %p2583_p12 = scmp.lt.s32.totalorder %s2581_s12, %s2574_s15 }
  0x2b   : > { %p2577_p9 = pnand %p2575_p8, %p3060_p7  ;;  %p2584_p13 = por %p2583_p12, %p2582_p11 }
  0x2d   : > { %p2578_p10 = pneg %p2577_p9 }
  0x2f   : > { %p2585_p0 = pnand %p2584_p13, %p2578_p10 }
  0x31   : > { %2588 = shalt.err (!%p2585_p0)
}
  0x32   : > { %s3505_s2 = sld [smem:[#allocation25_spill]]  ;;  %s2600_s6 = scalar_lea.vmem %s3050_s25, 4096 }
  0x33   : > { %p2601_p3 = scmp.ne.s32.totalorder %s3050_s25, %s2600_s6  ;;  %p2608_p9 = scmp.lt.s32.totalorder %s3050_s25, %s3050_s25 }
  0x34   : > { %p2609_p11 = scmp.lt.s32.totalorder %s2600_s6, %s2600_s6 }
  0x35   : > { %p2603_p5 = pnand %p2601_p3, %p3060_p7 }
  0x36   : > { %p2610_p10 = por %p2609_p11, %p2608_p9 }
  0x37   : > { %p2604_p8 = pneg %p2603_p5 }
  0x38   : > { %2398 = dma.hbm_to_vmem [thread:$0]  (!%p3054_p6), %s3505_s2, 16, %s416_s14, [#allocation7]  }
  0x39   : > { %p2611_p12 = pnand %p2610_p10, %p2604_p8 }
  0x3b   : > { %2614 = shalt.err (!%p2611_p12)
}
  0x3c   : > { %s2884_s15 = smov 256   ;;  %s2885_s4 = smov 16  }
  0x3d   : > { %s3506_s5 = sld [smem:[#allocation28_spill]]  ;;  %s2886_s14 = smov [#allocation8]  }
  0x3e   : > { %s425_s2 = sshll.u32 %s2886_s14, 4  ;;  %s2626_s1 = scalar_lea.vmem %s480_s9, 4096  ;;  %s426_s2 = int_to_ptr.vmem [resolvable:$true] %s425_s2 }
  0x3f   : > { %p2627_p13 = scmp.ne.s32.totalorder %s480_s9, %s2626_s1  ;;  %p2634_p5 = scmp.lt.s32.totalorder %s480_s9, %s480_s9 }
  0x40   : > { %p2635_p8 = scmp.lt.s32.totalorder %s2626_s1, %s2626_s1 }
  0x41   : > { %p2629_p0 = pnand %p2627_p13, %p3060_p7 }
  0x42   : > { %p2636_p9 = por %p2635_p8, %p2634_p5 }
  0x43   : > { %2404 = dma.hbm_to_vmem [thread:$0]  (!%p3054_p6), %s3506_s5, 4096, %s3050_s25, [#allocation10], %s2884_s15, %s2884_s15, %s2885_s4  }
  0x44   : > { %p2630_p3 = pneg %p2629_p0 }
  0x46   : > { %p2637_p11 = pnand %p2636_p9, %p2630_p3 }
  0x48   : > { %2640 = shalt.err (!%p2637_p11)
}
  0x49   : > { %s3507_s11 = sld [smem:[#allocation34_spill]]  ;;  %s2652_s25 = scalar_lea.vmem %s426_s2, 2048 }
  0x4a   : > { %p2653_p10 = scmp.ne.s32.totalorder %s426_s2, %s2652_s25  ;;  %p2660_p13 = scmp.lt.s32.totalorder %s426_s2, %s426_s2 }
  0x4b   : > { %p2661_p0 = scmp.lt.s32.totalorder %s2652_s25, %s2652_s25 }
  0x4c   : > { %p2655_p12 = pnand %p2653_p10, %p3060_p7 }
  0x4d   : > { %p2662_p2 = por %p2661_p0, %p2660_p13 }
  0x4e   : > { %p2656_p4 = pneg %p2655_p12 }
  0x4f   : > { %2410 = dma.hbm_to_vmem [thread:$0]  (!%p3054_p6), %s3507_s11, 4096, %s480_s9, [#allocation13], %s2884_s15, %s2884_s15, %s2885_s4  }
  0x50   : > { %p2663_p1 = pnand %p2662_p2, %p2656_p4 }
  0x52   : > { %2666 = shalt.err (!%p2663_p1)
}
  0x53   : > { %s3480_s1 = smov 128   ;;  %s3481_s12 = smov 8  }
  0x54   : > { %s3508_s3 = sld [smem:[#allocation26_spill]]  ;;  %s2889_s15 = smov [#allocation11]  }
  0x55   : > { %s457_s4 = sshll.u32 %s2889_s15, 4  ;;  %s2890_s10 = smov [#allocation14]   ;;  %s458_s4 = int_to_ptr.vmem [resolvable:$true] %s457_s4 }
  0x56   : > { %s495_s14 = sshll.u32 %s2890_s10, 4  ;;  %s2678_s6 = scalar_lea.vmem %s458_s4, 2048  ;;  %s496_s14 = int_to_ptr.vmem [resolvable:$true] %s495_s14 }
  0x57   : > { %p2679_p2 = scmp.ne.s32.totalorder %s458_s4, %s2678_s6  ;;  %p2686_p3 = scmp.lt.s32.totalorder %s458_s4, %s458_s4 }
  0x58   : > { %p2687_p5 = scmp.lt.s32.totalorder %s2678_s6, %s2678_s6 }
  0x59   : > { %p2681_p1 = pnand %p2679_p2, %p3060_p7 }
  0x5a   : > { %2401 = dma.hbm_to_vmem [thread:$0]  (!%p3054_p6), %s3508_s3, 2048, %s426_s2, [#allocation7], %s3480_s1, %s3480_s1, %s3481_s12  }
  0x5b   : > { %p2682_p4 = pneg %p2681_p1  ;;  %p2688_p8 = por %p2687_p5, %p2686_p3 }
  0x5d   : > { %p2689_p9 = pnand %p2688_p8, %p2682_p4 }
  0x5f   : > { %2692 = shalt.err (!%p2689_p9)
}
  0x60   : > { %s3509_s7 = sld [smem:[#allocation30_spill]]  ;;  %s2704_s9 = scalar_lea.vmem %s496_s14, 4096 }
  0x61   : > { %p2705_p11 = scmp.ne.s32.totalorder %s496_s14, %s2704_s9  ;;  %p2712_p13 = scmp.lt.s32.totalorder %s496_s14, %s496_s14 }
  0x62   : > { %p2713_p0 = scmp.lt.s32.totalorder %s2704_s9, %s2704_s9 }
  0x63   : > { %p2707_p10 = pnand %p2705_p11, %p3060_p7 }
  0x64   : > { %p2714_p2 = por %p2713_p0, %p2712_p13 }
  0x65   : > { %p2708_p12 = pneg %p2707_p10 }
  0x66   : > { %2407 = dma.hbm_to_vmem [thread:$0]  (!%p3054_p6), %s3509_s7, 2048, %s458_s4, [#allocation10], %s3480_s1, %s3480_s1, %s3481_s12  }
  0x67   : > { %p2715_p1 = pnand %p2714_p2, %p2708_p12 }
  0x69   : > { %2718 = shalt.err (!%p2715_p1)
}
  0x6a   : > { %s3510_s13 = sld [smem:[#allocation36_spill]]  ;;  %s2097_s8 = sadd.s32 4294967294, %s2879_s28  }
  0x6b   : > { %s43_s29 = sadd.s32 1, %s2871_s26  ;;  %s46_s4 = sadd.s32 1, %s2875_s27 }
  0x6c   : > { %p44_p7 = scmp.ge.s32.totalorder %s43_s29, 2  ;;  %s53_s10 = sadd.s32 1, %s2859_s23 }
  0x6d   : > { %p60_p4 = scmp.ne.s32.totalorder %s2859_s23, %s2855_s22  ;;  %p61_p3 = scmp.eq.s32.totalorder %s2879_s28, 0 }
  0x6e   : > { %s3547_s29 = smov (%p44_p7, %s43_s29), 0  ;;  %s3549_s4 = smov (!%p44_p7, %s46_s4), %s2875_s27 }
  0x6f   : > { %p3130_p5 = por %p61_p3, %p60_p4  ;;  %p48_p8 = scmp.ge.s32.totalorder %s3549_s4, 2 }
  0x70   : > { %2413 = dma.hbm_to_vmem [thread:$0]  (!%p3054_p6), %s3510_s13, 4096, %s496_s14, [#allocation13], %s3480_s1, %s3480_s1, %s3481_s12  }
  0x71   : > { %p66_p6 = scmp.ne.s32.totalorder %s2855_s22, %s2851_s21  ;;  %s371_s6 = ssub.s32 %s2871_s26, %s3547_s29 }
  0x72   : > { %p3512_p9 = scmp.ne.s32.totalorder %s3500_s30, 0  ;;  %s375_s25 = sadd.s32 1, %s2847_s20 }
  0x73   : > { %s3551_s4 = smov (%p48_p8, %s3549_s4), 0  ;;  %p385_p10 = scmp.ne.s32.totalorder %s2847_s20, %s2843_s19 }
  0x74   : > { %p3140_p11 = por %p3512_p9, %p66_p6  ;;  %3514 = sst [smem:[#allocation23_spill]] %s3551_s4 }
  0x75   : > { %p391_p12 = scmp.ne.s32.totalorder %s2843_s19, %s2839_s18  ;;  %s50_s9 = ssub.s32 %s2875_s27, %s3551_s4 }
  0x76   : > { %p392_p13 = scmp.eq.s32.totalorder %s2097_s8, 3  ;;  %p51_p0 = scmp.eq.s32.totalorder %s50_s9, 0 }
  0x77   : > { %s372_s21 = sor.u32 %s371_s6, %s50_s9  ;;  %p3515_p1 = scmp.ne.s32.totalorder %s3501_s16, 0 }
  0x78   : > { %p373_p2 = scmp.eq.s32.totalorder %s372_s21, 0  ;;  %p3165_p4 = por %p392_p13, %p391_p12 }
  0x79   : > { %p3155_p7 = por %p3515_p1, %p385_p10  ;;  %p2428_p3 = scmp.lt.s32.totalorder %s2879_s28, 4 }
  0x7a   : > { %s3160_s15 = scalar_select %p51_p0, %s2859_s23, %s53_s10  }
  0x7b   : > { %s3163_s1 = scalar_select %p373_p2, %s2847_s20, %s375_s25  }
  0x7c   : > { %s512_s3 = sand.u32 1, %s2859_s23   ;;  %s2147_s5 = sshll.u32 %s2875_s27, 8 }
  0x7d   : > { %s2106_s8 = sshll.u32 %s512_s3, 4  ;;  %s522_s16 = scalar_lea.hbm %s3459_s0, %s2147_s5 }
  0x7e   : > { %s516_s9 = scalar_lea.vmem [#allocation3], %s2106_s8  ;;  %p3177_p6 = pnand %p2428_p3, %p3130_p5 }
  0x7f   : > { %s523_s21 = sshll.u32 %s516_s9, 4  ;;  %s513_s25 = scalar_lea.sflag [#allocation4], %s512_s3  ;;  %s524_s21 = int_to_ptr.vmem [resolvable:$true] %s523_s21 }
  0x80   : > { %p2721_p8 = pneg %p3177_p6  ;;  %s2732_s11 = scalar_lea.vmem %s524_s21, 256 }
  0x81   : > { %p2733_p9 = scmp.ne.s32.totalorder %s524_s21, %s2732_s11  ;;  %s2891_s13 = smov [#allocation3]  }
  0x82   : > { %s2737_s4 = sshll.u32 %s2891_s13, 4  ;;  %s2738_s4 = int_to_ptr.vmem [resolvable:$false] %s2737_s4 }
  0x83   : > { %p2735_p10 = pnand %p2733_p9, %p2721_p8  ;;  %s2739_s5 = scalar_lea.vmem %s2738_s4, 512 }
  0x84   : > { %p2740_p13 = scmp.lt.s32.totalorder %s524_s21, %s2738_s4  ;;  %p2741_p0 = scmp.lt.s32.totalorder %s2739_s5, %s2732_s11 }
  0x85   : > { %p2736_p12 = pneg %p2735_p10 }
  0x86   : > { %p2742_p2 = por %p2741_p0, %p2740_p13 }
  0x88   : > { %p2743_p5 = pnand %p2742_p2, %p2736_p12 }
  0x8a   : > { %2746 = shalt.err (!%p2743_p5)
}
  0x8b   : > { %s3519_s7 = smov 8   ;;  %s3520_s14 = smov 128  }
  0x8c   : > { %2417 = dma.hbm_to_vmem [thread:$0]  (!%p3177_p6), %s522_s16, 256, %s524_s21, %s513_s25, %s3520_s14, %s3520_s14, %s3519_s7  }
  0x8d   : > { %p3521_p1 = scmp.ne.s32.totalorder %s3502_s17, 0 }
  0x8e   : > { %s537_s3 = sand.u32 (!%p3521_p1), 1, %s2855_s22  }
  0x8f   : > { %535 = sbr.rel (%p3521_p1) target bundleno = 2983 (0xba7), region = 80  ;;  %s2110_s13 = sshll.u32 (!%p3521_p1), %s537_s3, 4 }
  0x90   : > { %s538_s8 = scalar_lea.sflag (!%p3521_p1), [#allocation4], %s537_s3  ;;  %s541_s6 = scalar_lea.vmem (!%p3521_p1), [#allocation3], %s2110_s13 }
  0x94   : > { %2818 = dma.done.wait (%p3140_p11), %s538_s8, 256  }
  0x95   : > { %2820 = vsyncadd (%p3140_p11), %s538_s8, 4294967040  ;;  %p3522_p3 = scmp.ne.s32.totalorder %s3500_s30, 0 }
  0x97   : > { %2822 = dma.done.wait (%p3522_p3), [#allocation7], 2064  }
  0x98   : > { %2824 = vsyncadd (%p3522_p3), [#allocation7], 4294965232 }
  0x99   : > { %2826 = dma.done.wait (%p3522_p3), [#allocation10], 6144  }
  0x9a   : > { %2828 = vsyncadd (%p3522_p3), [#allocation10], 4294961152 }
  0x9b   : > { %2830 = dma.done.wait (%p3522_p3), [#allocation13], 8192  }
  0x9c   : > { %2832 = vsyncadd (%p3522_p3), [#allocation13], 4294959104  ;;  %s3523_s11 = sld [smem:[#allocation21_spill]]  ;;  %v614_v0 = vld [vmem:[%s541_s6] sm:$0xff]  ;;  %v615_v2 = vld [vmem:[%s541_s6 + $0x8] sm:$0xff]  ;;  %v2892_v7 = vmov 0.0  }
  0x9d   : > { %616 = vadd.xlane.f32.xlu0 %v614_v0  ;;  %v702_v3 = vld [vmem:[#allocation9 + $0xf8] sm:$0xff]  ;;  %v701_v4 = vld [vmem:[#allocation9 + $0xf0] sm:$0xff]  ;;  %v700_v5 = vld [vmem:[#allocation9 + $0xe8] sm:$0xff]  ;;  %2241 = vmatprep.subr.mxu1 %v2892_v7  ;;  %vm2893_vm0 = vmmov 0   ;;  %s3524_s16 = sld [smem:[#allocation24_spill]]  ;;  %vm886_vm1 = vcmask 261120  }
  0x9e   : > { %715 = vmatprep.subr.mxu0 %v702_v3  ;;  %v699_v6 = vld [vmem:[#allocation9 + $0xe0] sm:$0xff]  ;;  %v698_v8 = vld [vmem:[#allocation9 + $0xd8] sm:$0xff]  ;;  %779 = vmatprep.mubr.f32.mxu0 %v2892_v7  ;;  %v697_v10 = vld [vmem:[#allocation9 + $0xd0] sm:$0xff]  ;;  %s3525_s10 = sld [smem:[#allocation29_spill]]  ;;  %s2894_s14 = smov 96   ;;  %vm966_vm2 = vcmask 130048  }
  0x9f   : > { %716 = vmatpush1.msra.mxu0 %v701_v4  ;;  %v807_v9 = vld [vmem:[#allocation8 + $0x78] sm:$0xff]  ;;  %v806_v11 = vld [vmem:[#allocation8 + $0x70] sm:$0xff]  ;;  %v696_v12 = vld [vmem:[#allocation9 + $0xc8] sm:$0xff]  ;;  %2273 = vmatprep.mubr.msk.f32.mxu1 %vm2893_vm0, %v2892_v7  ;;  %s3526_s7 = sld [smem:[#allocation27_spill]]  ;;  %s2895_s3 = smov 64   ;;  %vm1230_vm3 = vcmask 523520  }
  0xa0   : > { %717 = vmatprep.subr.mxu0 %v700_v5  ;;  %2242 = vmatpush3.msra.mxu1 %v807_v9  ;;  %v695_v13 = vld [vmem:[#allocation9 + $0xc0] sm:$0xff]  ;;  %v694_v26 = vld [vmem:[#allocation9 + $0xb8] sm:$0xff]  ;;  %v693_v27 = vld [vmem:[#allocation9 + $0xb0] sm:$0xff]  ;;  %s2896_s13 = smov 32   ;;  %vm1408_vm4 = vcmask 785920   ;;  %vm1586_vm5 = vcmask 1048320  }
  0xa1   : > { %618 = vadd.xlane.f32.xlu0 %v615_v2  ;;  %718 = vmatpush1.msra.mxu0 %v699_v6  ;;  %v805_v28 = vld [vmem:[#allocation8 + $0x68] sm:$0xff]  ;;  %v691_v30 = vld [vmem:[#allocation9 + $0xa0] sm:$0xff]  ;;  %v690_v32 = vld [vmem:[#allocation9 + $0x98] sm:$0xff]  ;;  %s3528_s2 = sld [smem:[#allocation32_spill]] }
  0xa2   : > { %s2120_s17 = sshll.u32 %s3523_s11, 3  ;;  %2243 = vmatprep.subr.mxu1 %v2892_v7  ;;  %719 = vmatprep.subr.mxu0 %v698_v8  ;;  %v692_v29 = vld [vmem:[#allocation9 + $0xa8] sm:$0xff]  ;;  %v804_v31 = vld [vmem:[#allocation8 + $0x60] sm:$0xff]  ;;  %v689_v33 = vld [vmem:[#allocation9 + $0x90] sm:$0xff]  ;;  %s3529_s21 = sld [smem:[#allocation33_spill]] }
  0xa3   : > { %s656_s4 = scalar_lea.vmem %s541_s6, %s2120_s17 [#allocation3]  ;;  %2244 = vmatpush3.msra.mxu1 %v806_v11  ;;  %720 = vmatpush1.msra.mxu0 %v697_v10  ;;  %v803_v34 = vld [vmem:[#allocation8 + $0x58] sm:$0xff]  ;;  %v688_v35 = vld [vmem:[#allocation9 + $0x88] sm:$0xff]  ;;  %v687_v36 = vld [vmem:[#allocation9 + $0x80] sm:$0xff]  ;;  %s3527_s17 = sld [smem:[#allocation31_spill]] }
  0xa4   : > { %v3208_v1 = vld [vmem:[%s656_s4] sm:$0xff]  ;;  %2245 = vmatprep.subr.mxu1 %v2892_v7  ;;  %721 = vmatprep.subr.mxu0 %v696_v12  ;;  %v801_v40 = vld [vmem:[#allocation8 + $0x48] sm:$0xff]  ;;  %v683_v42 = vld [vmem:[#allocation9 + $0x60] sm:$0xff]  ;;  %s3532_s4 = sld [smem:[#allocation37_spill]] }
  0xa5   : > { %658 = vadd.xlane.f32.xlu1 %v3208_v1  ;;  %722 = vmatpush1.msra.mxu0 %v695_v13  ;;  %v802_v37 = vld [vmem:[#allocation8 + $0x50] sm:$0xff]  ;;  %v686_v38 = vld [vmem:[#allocation9 + $0x78] sm:$0xff]  ;;  %v684_v41 = vld [vmem:[#allocation9 + $0x68] sm:$0xff]  ;;  %s3533_s25 = sld [smem:[#allocation38_spill]] }
  0xa6   : > { %723 = vmatprep.subr.mxu0 %v694_v26  ;;  %2246 = vmatpush3.msra.mxu1 %v805_v28  ;;  %v685_v39 = vld [vmem:[#allocation9 + $0x70] sm:$0xff]  ;;  %v800_v43 = vld [vmem:[#allocation8 + $0x40] sm:$0xff]  ;;  %v682_v44 = vld [vmem:[#allocation9 + $0x58] sm:$0xff] }
  0xa7   : > { %724 = vmatpush1.msra.mxu0 %v693_v27  ;;  %2247 = vmatprep.subr.mxu1 %v2892_v7  ;;  %v681_v45 = vld [vmem:[#allocation9 + $0x50] sm:$0xff]  ;;  %v799_v46 = vld [vmem:[#allocation8 + $0x38] sm:$0xff]  ;;  %v680_v47 = vld [vmem:[#allocation9 + $0x48] sm:$0xff] }
  0xa8   : > { %725 = vmatprep.subr.mxu0 %v692_v29  ;;  %2248 = vmatpush3.msra.mxu1 %v804_v31  ;;  %v679_v48 = vld [vmem:[#allocation9 + $0x40] sm:$0xff]  ;;  %v798_v49 = vld [vmem:[#allocation8 + $0x30] sm:$0xff]  ;;  %v678_v50 = vld [vmem:[#allocation9 + $0x38] sm:$0xff] }
  0xa9   : > { %726 = vmatpush1.msra.mxu0 %v691_v30  ;;  %2249 = vmatprep.subr.mxu1 %v2892_v7  ;;  %v677_v51 = vld [vmem:[#allocation9 + $0x30] sm:$0xff]  ;;  %v797_v52 = vld [vmem:[#allocation8 + $0x28] sm:$0xff]  ;;  %v675_v54 = vld [vmem:[#allocation9 + $0x20] sm:$0xff] }
  0xaa   : > { %727 = vmatprep.subr.mxu0 %v690_v32  ;;  %2250 = vmatpush3.msra.mxu1 %v803_v34  ;;  %v676_v53 = vld [vmem:[#allocation9 + $0x28] sm:$0xff]  ;;  %v796_v55 = vld [vmem:[#allocation8 + $0x20] sm:$0xff]  ;;  %v674_v56 = vld [vmem:[#allocation9 + $0x18] sm:$0xff] }
  0xab   : > { %728 = vmatpush1.msra.mxu0 %v689_v33  ;;  %2251 = vmatprep.subr.mxu1 %v2892_v7  ;;  %v673_v57 = vld [vmem:[#allocation9 + $0x10] sm:$0xff]  ;;  %v795_v58 = vld [vmem:[#allocation8 + $0x18] sm:$0xff]  ;;  %v672_v59 = vld [vmem:[#allocation9 + $0x8] sm:$0xff]  ;;  %s3534_s5 = smov %s3533_s25 }
  0xac   : > { %729 = vmatprep.subr.mxu0 %v688_v35  ;;  %2252 = vmatpush3.msra.mxu1 %v802_v37  ;;  %v671_v60 = vld [vmem:[#allocation9] sm:$0xff]  ;;  %v794_v61 = vld [vmem:[#allocation8 + $0x10] sm:$0xff]  ;;  %v793_v62 = vld [vmem:[#allocation8 + $0x8] sm:$0xff] }
  0xad   : > { %730 = vmatpush1.msra.mxu0 %v687_v36  ;;  %2253 = vmatprep.subr.mxu1 %v2892_v7  ;;  %v792_v63 = vld [vmem:[#allocation8] sm:$0xff]  ;;  %v2118_v12 = vld [vmem:[%s3524_s16] ss:$0 sm:$0xff] }
  0xae   : > { %731 = vmatprep.subr.mxu0 %v686_v38  ;;  %2254 = vmatpush3.msra.mxu1 %v801_v40  ;;  %v703_v29 = vld [vmem:[%s3525_s10] sm:$0x3]  ;;  %s3530_s10 = sld [smem:[#allocation22_spill]] }
  0xaf   : > { %732 = vmatpush1.msra.mxu0 %v685_v39  ;;  %2255 = vmatprep.subr.mxu1 %v2892_v7  ;;  %v2121_v31 = vld [vmem:[%s3526_s7] ss:$0 sm:$0xff]  ;;  %s3531_s7 = sld [smem:[#allocation35_spill]] }
  0xb0   : > { %733 = vmatprep.subr.mxu0 %v684_v41  ;;  %2256 = vmatpush3.msra.mxu1 %v800_v43 }
  0xb1   : > { %734 = vmatpush1.msra.mxu0 %v683_v42  ;;  %2257 = vmatprep.subr.mxu1 %v2892_v7 }
  0xb2   : > { %735 = vmatprep.subr.mxu0 %v682_v44  ;;  %2258 = vmatpush3.msra.mxu1 %v799_v46 }
  0xb3   : > { %736 = vmatpush1.msra.mxu0 %v681_v45  ;;  %2259 = vmatprep.subr.mxu1 %v2892_v7 }
  0xb4   : > { %737 = vmatprep.subr.mxu0 %v680_v47  ;;  %2260 = vmatpush3.msra.mxu1 %v798_v49 }
  0xb5   : > { %738 = vmatpush1.msra.mxu0 %v679_v48  ;;  %2261 = vmatprep.subr.mxu1 %v2892_v7 }
  0xb6   : > { %739 = vmatprep.subr.mxu0 %v678_v50  ;;  %2262 = vmatpush3.msra.mxu1 %v797_v52 }
  0xb7   : > { %740 = vmatpush1.msra.mxu0 %v677_v51  ;;  %2263 = vmatprep.subr.mxu1 %v2892_v7 }
  0xb8   : > { %741 = vmatprep.subr.mxu0 %v676_v53  ;;  %2264 = vmatpush3.msra.mxu1 %v796_v55 }
  0xb9   : > { %742 = vmatpush1.msra.mxu0 %v675_v54  ;;  %2265 = vmatprep.subr.mxu1 %v2892_v7 }
  0xba   : > { %743 = vmatprep.subr.mxu0 %v674_v56  ;;  %2266 = vmatpush3.msra.mxu1 %v795_v58 }
  0xbb   : > { %744 = vmatpush1.msra.mxu0 %v673_v57  ;;  %2267 = vmatprep.subr.mxu1 %v2892_v7 }
  0xbc   : > { %745 = vmatprep.subr.mxu0 %v672_v59  ;;  %2268 = vmatpush3.msra.mxu1 %v794_v61 }
  0xbd   : > { %746 = vmatpush1.msra.mxu0 %v671_v60  ;;  %2269 = vmatprep.subr.mxu1 %v2892_v7 }
  0xbe   : > { %2297 = vmatprep.subr.mxu0 %v2892_v7  ;;  %2270 = vmatpush3.msra.mxu1 %v793_v62 }
  0xbf   : > { %2271 = vmatprep.subr.mxu1 %v2892_v7 }
  0xc0   : > { %2272 = vmatpush3.msra.mxu1 %v792_v63 }
  0xc1   : > { %2276 = vmatprep.subr.mxu1 %v2892_v7 }
 0x126   : > { %v617_v14 = vpop.xlane.xlu0 %616 }
 0x127   : > { %v621_v16 = vmul.f32 0.0078125, %v617_v14  ;;  %v2119_v14 = vld [vmem:[#allocation6] ss:$0 sm:$0xff] }
 0x129   : > { %v3215_v18 = vsub.f32 %v614_v0, %v621_v16 }
 0x12a   : > { %v619_v20 = vpop.xlane.xlu0 %618 }
 0x12b   : > { %v622_v21 = vmul.f32 0.0078125, %v619_v20  ;;  %v625_v22 = vmul.f32 %v3215_v18, %v3215_v18 }
 0x12d   : > { %v3222_v23 = vsub.f32 %v615_v2, %v622_v21  ;;  %627 = vadd.xlane.f32.xlu1 %v625_v22 }
 0x12e   : > { %v659_v15 = vpop.xlane.xlu1 %658 }
 0x12f   : > { %v660_v17 = vmul.f32 0.0078125, %v659_v15  ;;  %v626_v25 = vmul.f32 %v3222_v23, %v3222_v23 }
 0x131   : > { %v3218_v19 = vsub.f32 %v3208_v1, %v660_v17  ;;  %629 = vadd.xlane.f32.xlu0 %v626_v25 }
 0x133   : > { %v662_v24 = vmul.f32 %v3218_v19, %v3218_v19 }
 0x135   : > { %663 = vadd.xlane.f32.xlu1 %v662_v24 }
 0x1b6   : > { %v628_v0 = vpop.xlane.xlu1 %627 }
 0x1b7   : > { %v631_v2 = vmul.f32 0.0078125, %v628_v0 }
 0x1b9   : > { %v633_v3 = vadd.f32 1e-05, %v631_v2 }
 0x1ba   : > { %v630_v5 = vpop.xlane.xlu0 %629 }
 0x1bb   : > { %2539 = vrsqrt.f32 %v633_v3  ;;  %v632_v8 = vmul.f32 0.0078125, %v630_v5 }
 0x1bd   : > { %v634_v10 = vadd.f32 1e-05, %v632_v8 }
 0x1be   : > { %v664_v4 = vpop.xlane.xlu1 %663 }
 0x1bf   : > { %v665_v6 = vmul.f32 0.0078125, %v664_v4 }
 0x1c1   : > { %v666_v9 = vadd.f32 1e-05, %v665_v6 }
 0x1c3   : > { %2541 = vrsqrt.f32 %v666_v9 }
 0x1c4   : > { %2543 = vrsqrt.f32 %v634_v10 }
 0x1c8   : > { %v2540_v11 = vpop.eup %2539 }
 0x1c9   : > { %v637_v13 = vmul.f32 %v2540_v11, %v3215_v18  ;;  %v705_v18 = vlaneseq }
 0x1cb   : > { %v645_v15 = vmul.f32 %v2118_v12, %v637_v13  ;;  %v3256_v28 = vshrl.u32 %v705_v18, 7 }
 0x1cd   : > { %v653_v20 = vadd.f32 %v2119_v14, %v645_v15  ;;  %v711_v38 = vsub.s32 1, %v3256_v28 }
 0x1cf   : > { %780 = vmatmul.mubr.f32.vlgmr.msra.gmra.mxu0 %v653_v20  ;;  %v712_v42 = vrot.slane %v703_v29, %v711_v38 }
 0x1d0   : > { %v2542_v16 = vpop.eup %2541  ;;  %785 = vmatprep.mubr.f32.mxu0 %v2892_v7 }
 0x1d1   : > { %v2544_v17 = vpop.eup %2543  ;;  %v668_v21 = vmul.f32 %v2542_v16, %v3218_v19  ;;  %v707_v19 = vsub.s32 0, %v3256_v28 }
 0x1d2   : > { %v638_v22 = vmul.f32 %v2544_v17, %v3222_v23 }
 0x1d3   : > { %v669_v24 = vmul.f32 %v2118_v12, %v668_v21  ;;  %v708_v32 = vrot.slane %v703_v29, %v707_v19 }
 0x1d4   : > { %v646_v25 = vmul.f32 %v2118_v12, %v638_v22 }
 0x1d5   : > { %v670_v26 = vadd.f32 %v2119_v14, %v669_v24 }
 0x1d6   : > { %v654_v27 = vadd.f32 %v2119_v14, %v646_v25 }
 0x1d7   : > { %2274 = vmatmul.mubr.f32.vlgmr.msra.gmra.mxu1 %v670_v26 }
 0x1d8   : > { %786 = vmatmul.mubr.f32.gmra.mxu0 %v654_v27  ;;  %2280 = vmatprep.mubr.msk.f32.mxu1 %vm2893_vm0, %v2892_v7 }
 0x1d9   : > { %2301 = vmatprep.mubr.msk.f32.mxu0 %vm2893_vm0, %v2892_v7 }
 0x28f   : > { %v781_v23 = vpop.f32.mrf.mxu0 }
 0x290   : > { %v782_v39 = vadd.f32 %v781_v23, %v708_v32 }
 0x291   : > { %v783_v30 = vpop.f32.mrf.mxu0 }
 0x292   : > { %v3279_v44 = vadd.f32 %v783_v30, %v712_v42 }
 0x297   : > { %v881_v33 = vpop.f32.mrf.mxu1 }
 0x298   : > { %v787_v34 = vpop.f32.mrf.mxu0  ;;  %v882_v36 = vadd.f32 %v2121_v31, %v881_v33 }
 0x299   : > { %v788_v35 = vadd.f32 %v787_v34, %v708_v32  ;;  %v2275_v37 = vpop.f32.mrf.mxu1 }
 0x29a   : > { %v885_v40 = vmul.f32 0.03125, %v882_v36  ;;  %v789_v41 = vpop.f32.mrf.mxu0 }
 0x29b   : > { %1056 = vrot.lane.b32.xlu1 %v788_v35, %s2894_s14  ;;  %2277 = vmatpush3.xpose.msk.msra.mxu1 %vm886_vm1, %v788_v35  ;;  %v3276_v43 = vadd.f32 %v789_v41, %v712_v42 }
 0x29c   : > { %2278 = vmatprep.subr.mxu1 %v2892_v7 }
 0x29f   : > { %1052 = vrot.lane.b32.xlu1 %v885_v40, %s2894_s14  ;;  %2279 = vmatpush3.xpose.msk.msra.mxu1 %vm886_vm1, %v782_v39 }
 0x2a0   : > { %2283 = vmatprep.subr.mxu1 %v2892_v7 }
 0x2a2   : > { %2281 = vmatmul.mubr.msk.f32.vlgmr.msra.gmra.mxu1 %vm886_vm1, %v885_v40 }
 0x2a3   : > { %1236 = vrot.lane.b32.xlu1 %v788_v35, %s2895_s3  ;;  %2284 = vmatpush3.msra.mxu1 %v3276_v43 }
 0x2a4   : > { %2285 = vmatprep.subr.mxu1 %v2892_v7  ;;  %2287 = vmatprep.mubr.msk.f32.mxu1 %vm2893_vm0, %v2892_v7 }
 0x2a5   : > { %2286 = vmatpush3.msra.mxu1 %v3279_v44 }
 0x2a6   : > { %2290 = vmatprep.subr.mxu1 %v2892_v7 }
 0x2a7   : > { %1234 = vrot.lane.b32.xlu1 %v782_v39, %s2895_s3 }
 0x30d   : > { %v1057_v51 = vpop.permute.xlu1 %1056 }
 0x311   : > { %v1053_v53 = vpop.permute.xlu1 %1052 }
 0x315   : > { %v1237_v55 = vpop.permute.xlu1 %1236 }
 0x319   : > { %v1235_v57 = vpop.permute.xlu1 %1234 }
 0x362   : > { %v962_v45 = vpop.f32.mrf.mxu1 }
 0x363   : > { %v967_v46 = vsel %vm966_vm2, %v962_v45, -inf }
 0x364   : > { %968 = vmax.xlane.f32.xlu0 %v967_v46  ;;  %v2282_v47 = vpop.f32.mrf.mxu1 }
 0x37a   : > { %1054 = vrot.lane.b32.xlu0 %v782_v39, %s2894_s14 }
 0x37e   : > { %1232 = vrot.lane.b32.xlu0 %v885_v40, %s2895_s3 }
 0x382   : > { %1326 = vrot.lane.b32.xlu0 %v3276_v43, %s2895_s3 }
 0x386   : > { %1324 = vrot.lane.b32.xlu0 %v3279_v44, %s2895_s3 }
 0x38a   : > { %1414 = vrot.lane.b32.xlu0 %v788_v35, %s2896_s13 }
 0x38e   : > { %1412 = vrot.lane.b32.xlu0 %v782_v39, %s2896_s13 }
 0x392   : > { %1410 = vrot.lane.b32.xlu0 %v885_v40, %s2896_s13 }
 0x3ed   : > { %v969_v48 = vpop.xlane.xlu0 %968 }
 0x3ee   : > { %v970_v49 = vsub.f32 %v962_v45, %v969_v48  ;;  %v1604_v48 = vld [vmem:[#allocation11 + $0x78] sm:$0xff] }
 0x3f0   : > { %v971_v50 = vmul.f32 1.442695, %v970_v49  ;;  %v1603_v49 = vld [vmem:[#allocation11 + $0x70] sm:$0xff] }
 0x3f1   : > { %v1055_v54 = vpop.permute.xlu0 %1054 }
 0x3f2   : > { %2545 = vpow2.f32 %v971_v50  ;;  %v1602_v50 = vld [vmem:[#allocation11 + $0x68] sm:$0xff] }
 0x3f5   : > { %v1233_v56 = vpop.permute.xlu0 %1232 }
 0x3f9   : > { %v1327_v58 = vpop.permute.xlu0 %1326 }
 0x3fd   : > { %v1325_v59 = vpop.permute.xlu0 %1324 }
 0x3ff   : > { %v3299_v52 = vpop.eup %2545 }
 0x400   : > { %2288 = vmatmul.mubr.msk.f32.vlgmr.msra.gmra.mxu1 %vm966_vm2, %v3299_v52  ;;  %v973_v24 = vsel %vm966_vm2, %v3299_v52, 0.0  ;;  %v1600_v52 = vld [vmem:[#allocation11 + $0x58] sm:$0xff] }
 0x401   : > { %2291 = vmatpush3.xpose.msk.msra.mxu1 %vm886_vm1, %v1057_v51  ;;  %2294 = vmatprep.mubr.msk.f32.mxu1 %vm2893_vm0, %v2892_v7  ;;  %v1415_v5 = vpop.permute.xlu0 %1414  ;;  %v1601_v51 = vld [vmem:[#allocation11 + $0x60] sm:$0xff] }
 0x402   : > { %2292 = vmatprep.subr.mxu1 %v2892_v7 }
 0x405   : > { %2293 = vmatpush3.xpose.msk.msra.mxu1 %vm886_vm1, %v1055_v54  ;;  %v1413_v6 = vpop.permute.xlu0 %1412  ;;  %v1598_v54 = vld [vmem:[#allocation11 + $0x48] sm:$0xff] }
 0x406   : > { %2304 = vmatprep.subr.mxu1 %v2892_v7 }
 0x408   : > { %2295 = vmatmul.mubr.msk.f32.vlgmr.msra.gmra.mxu1 %vm886_vm1, %v1053_v53  ;;  %v1599_v53 = vld [vmem:[#allocation11 + $0x50] sm:$0xff] }
 0x409   : > { %2305 = vmatpush3.xpose.msk.msra.mxu1 %vm886_vm1, %v1237_v55  ;;  %2308 = vmatprep.mubr.msk.f32.mxu1 %vm2893_vm0, %v2892_v7  ;;  %v1411_v8 = vpop.permute.xlu0 %1410  ;;  %v1597_v55 = vld [vmem:[#allocation11 + $0x40] sm:$0xff] }
 0x40a   : > { %2306 = vmatprep.subr.mxu1 %v2892_v7 }
 0x40d   : > { %2307 = vmatpush3.xpose.msk.msra.mxu1 %vm886_vm1, %v1235_v57  ;;  %v1595_v57 = vld [vmem:[#allocation11 + $0x30] sm:$0xff] }
 0x40e   : > { %2311 = vmatprep.subr.mxu1 %v2892_v7 }
 0x410   : > { %2309 = vmatmul.mubr.msk.f32.vlgmr.msra.gmra.mxu1 %vm886_vm1, %v1233_v56  ;;  %v1596_v56 = vld [vmem:[#allocation11 + $0x38] sm:$0xff] }
 0x411   : > { %2312 = vmatpush3.msra.mxu1 %v1327_v58  ;;  %2315 = vmatprep.mubr.msk.f32.mxu1 %vm2893_vm0, %v2892_v7  ;;  %v1594_v58 = vld [vmem:[#allocation11 + $0x28] sm:$0xff] }
 0x412   : > { %2313 = vmatprep.subr.mxu1 %v2892_v7 }
 0x413   : > { %2314 = vmatpush3.msra.mxu1 %v1325_v59  ;;  %v1593_v59 = vld [vmem:[#allocation11 + $0x20] sm:$0xff] }
 0x414   : > { %2318 = vmatprep.subr.mxu1 %v2892_v7 }
 0x4c0   : > { %v1046_v60 = vpop.f32.mrf.mxu1 }
 0x4c2   : > { %v2289_v61 = vpop.f32.mrf.mxu1 }
 0x4c8   : > { %v1130_v62 = vpop.f32.mrf.mxu1 }
 0x4c9   : > { %v1134_v63 = vsel %vm966_vm2, %v1130_v62, -inf }
 0x4ca   : > { %1135 = vmax.xlane.f32.xlu0 %v1134_v63  ;;  %v2296_v0 = vpop.f32.mrf.mxu1  ;;  %v1592_v63 = vld [vmem:[#allocation11 + $0x18] sm:$0xff] }
 0x4cb   : > { %v1591_v0 = vld [vmem:[#allocation11 + $0x10] sm:$0xff] }
 0x4d0   : > { %v1310_v2 = vpop.f32.mrf.mxu1 }
 0x4d1   : > { %v1314_v3 = vsel %vm966_vm2, %v1310_v2, -inf }
 0x4d2   : > { %1315 = vmax.xlane.f32.xlu1 %v1314_v3  ;;  %v2310_v4 = vpop.f32.mrf.mxu1  ;;  %v1589_v3 = vld [vmem:[#allocation11] sm:$0xff] }
 0x4e0   : > { %1146 = vrot.lane.b32.xlu0 %v3279_v44, %s2894_s14 }
 0x4e3   : > { %1148 = vrot.lane.b32.xlu1 %v3276_v43, %s2894_s14 }
 0x4e7   : > { %1504 = vrot.lane.b32.xlu1 %v3276_v43, %s2896_s13 }
 0x553   : > { %v1136_v9 = vpop.xlane.xlu0 %1135 }
 0x554   : > { %v1137_v10 = vsub.f32 %v1130_v62, %v1136_v9 }
 0x556   : > { %v1138_v11 = vmul.f32 1.442695, %v1137_v10 }
 0x557   : > { %v1147_v16 = vpop.permute.xlu0 %1146 }
 0x558   : > { %2547 = vpow2.f32 %v1138_v11  ;;  %v2138_v11 = vld [vmem:[%s3527_s17] ss:$0 sm:$0xff] }
 0x55b   : > { %v1316_v12 = vpop.xlane.xlu1 %1315 }
 0x55c   : > { %v1317_v13 = vsub.f32 %v1310_v2, %v1316_v12  ;;  %v1590_v2 = vld [vmem:[#allocation11 + $0x8] sm:$0xff] }
 0x55e   : > { %v1318_v14 = vmul.f32 1.442695, %v1317_v13 }
 0x55f   : > { %v1149_v15 = vpop.permute.xlu1 %1148 }
 0x560   : > { %2549 = vpow2.f32 %v1318_v14  ;;  %2298 = vmatpush3.msra.mxu0 %v1149_v15  ;;  %v1741_v15 = vld [vmem:[#allocation12 + $0xf8] sm:$0xff] }
 0x561   : > { %2299 = vmatprep.subr.mxu0 %v2892_v7 }
 0x562   : > { %2300 = vmatpush3.msra.mxu0 %v1147_v16  ;;  %v1740_v16 = vld [vmem:[#allocation12 + $0xf0] sm:$0xff] }
 0x563   : > { %2325 = vmatprep.subr.mxu0 %v2892_v7  ;;  %v1505_v20 = vpop.permute.xlu1 %1504 }
 0x565   : > { %v2548_v17 = vpop.eup %2547 }
 0x566   : > { %2302 = vmatmul.mubr.msk.f32.vlgmr.msra.gmra.mxu0 %vm966_vm2, %v2548_v17  ;;  %v1140_v37 = vsel %vm966_vm2, %v2548_v17, 0.0  ;;  %v1739_v17 = vld [vmem:[#allocation12 + $0xe8] sm:$0xff] }
 0x567   : > { %2326 = vmatpush3.msra.mxu0 %v1505_v20  ;;  %2329 = vmatprep.mubr.msk.f32.mxu0 %vm2893_vm0, %v2892_v7  ;;  %v1738_v20 = vld [vmem:[#allocation12 + $0xe0] sm:$0xff] }
 0x568   : > { %2327 = vmatprep.subr.mxu0 %v2892_v7 }
 0x56d   : > { %v2550_v21 = vpop.eup %2549 }
 0x56e   : > { %2316 = vmatmul.mubr.msk.f32.vlgmr.msra.gmra.mxu1 %vm966_vm2, %v2550_v21  ;;  %v1320_v22 = vsel %vm966_vm2, %v2550_v21, 0.0  ;;  %v1737_v21 = vld [vmem:[#allocation12 + $0xd8] sm:$0xff] }
 0x56f   : > { %2319 = vmatpush3.xpose.msk.msra.mxu1 %vm886_vm1, %v1415_v5  ;;  %1321 = vadd.xlane.f32.xlu0 %v1320_v22  ;;  %v1736_v22 = vld [vmem:[#allocation12 + $0xd0] sm:$0xff] }
 0x570   : > { %2320 = vmatprep.subr.mxu1 %v2892_v7  ;;  %2322 = vmatprep.mubr.msk.f32.mxu1 %vm2893_vm0, %v2892_v7 }
 0x573   : > { %2321 = vmatpush3.xpose.msk.msra.mxu1 %vm886_vm1, %v1413_v6  ;;  %974 = vadd.xlane.f32.xlu0 %v973_v24  ;;  %v1735_v24 = vld [vmem:[#allocation12 + $0xc8] sm:$0xff] }
 0x574   : > { %1754 = vmatprep.subr.mxu1 %v1741_v15 }
 0x576   : > { %2323 = vmatmul.mubr.msk.f32.vlgmr.msra.gmra.mxu1 %vm886_vm1, %v1411_v8 }
 0x577   : > { %1818 = vmatprep.mubr.f32.mxu1 %v2892_v7  ;;  %1755 = vmatpush1.msra.mxu1 %v1740_v16 }
 0x578   : > { %1756 = vmatprep.subr.mxu1 %v1739_v17 }
 0x579   : > { %1757 = vmatpush1.msra.mxu1 %v1738_v20 }
 0x57a   : > { %1758 = vmatprep.subr.mxu1 %v1737_v21  ;;  %v2139_v21 = vld [vmem:[%s3528_s2] ss:$0 sm:$0xff] }
 0x57b   : > { %1759 = vmatpush1.msra.mxu1 %v1736_v22 }
 0x57c   : > { %1760 = vmatprep.subr.mxu1 %v1735_v24  ;;  %v2140_v24 = vld [vmem:[%s3529_s21] ss:$0 sm:$0xff] }
 0x5f8   : > { %v1322_v25 = vpop.xlane.xlu0 %1321 }
 0x5fc   : > { %v975_v26 = vpop.xlane.xlu0 %974 }
 0x5fd   : > { %2551 = vrcp.f32 %v975_v26 }
 0x5fe   : > { %2553 = vrcp.f32 %v1322_v25  ;;  %v1734_v25 = vld [vmem:[#allocation12 + $0xc0] sm:$0xff] }
 0x5ff   : > { %1761 = vmatpush1.msra.mxu1 %v1734_v25 }
 0x60a   : > { %v2552_v27 = vpop.eup %2551 }
 0x60b   : > { %v1050_v18 = vmul.f32 %v2552_v27, %v1046_v60  ;;  %v2554_v30 = vpop.eup %2553 }
 0x60d   : > { %1051 = vst.msk [vmem:[#allocation2] sm:$0xff] %vm886_vm1, %v1050_v18 }
 0x626   : > { %v1221_v23 = vpop.f32.mrf.mxu0 }
 0x628   : > { %v2303_v29 = vpop.f32.mrf.mxu0 }
 0x629   : > { %v1732_v29 = vld [vmem:[#allocation12 + $0xb0] sm:$0xff] }
 0x62e   : > { %v1399_v31 = vpop.f32.mrf.mxu1 }
 0x62f   : > { %v1403_v32 = vmul.f32 %v2554_v30, %v1399_v31  ;;  %v1731_v30 = vld [vmem:[#allocation12 + $0xa8] sm:$0xff]  ;;  %v1730_v31 = vld [vmem:[#allocation12 + $0xa0] sm:$0xff] }
 0x630   : > { %v2317_v33 = vpop.f32.mrf.mxu1 }
 0x631   : > { %1405 = vrot.lane.b32.xlu0 %v1403_v32, %s2895_s3  ;;  %v1729_v32 = vld [vmem:[#allocation12 + $0x98] sm:$0xff]  ;;  %v1728_v33 = vld [vmem:[#allocation12 + $0x90] sm:$0xff] }
 0x636   : > { %v1488_v34 = vpop.f32.mrf.mxu1 }
 0x637   : > { %v1492_v35 = vsel %vm966_vm2, %v1488_v34, -inf }
 0x638   : > { %1493 = vmax.xlane.f32.xlu1 %v1492_v35  ;;  %v2324_v36 = vpop.f32.mrf.mxu1  ;;  %v1726_v35 = vld [vmem:[#allocation12 + $0x80] sm:$0xff] }
 0x639   : > { %v1725_v36 = vld [vmem:[#allocation12 + $0x78] sm:$0xff] }
 0x649   : > { %1502 = vrot.lane.b32.xlu1 %v3279_v44, %s2896_s13 }
 0x66d   : > { %1141 = vadd.xlane.f32.xlu1 %v1140_v37  ;;  %v1724_v37 = vld [vmem:[#allocation12 + $0x70] sm:$0xff] }
 0x6a3   : > { %v1406_v62 = vpop.permute.xlu0 %1405 }
 0x6c1   : > { %v1494_v39 = vpop.xlane.xlu1 %1493 }
 0x6c2   : > { %v1495_v40 = vsub.f32 %v1488_v34, %v1494_v39  ;;  %v1727_v34 = vld [vmem:[#allocation12 + $0x88] sm:$0xff] }
 0x6c3   : > { %v1723_v39 = vld [vmem:[#allocation12 + $0x68] sm:$0xff] }
 0x6c4   : > { %v1496_v41 = vmul.f32 1.442695, %v1495_v40  ;;  %v1722_v40 = vld [vmem:[#allocation12 + $0x60] sm:$0xff] }
 0x6c5   : > { %v1503_v42 = vpop.permute.xlu1 %1502 }
 0x6c6   : > { %2555 = vpow2.f32 %v1496_v41  ;;  %2328 = vmatpush3.msra.mxu0 %v1503_v42  ;;  %v1721_v41 = vld [vmem:[#allocation12 + $0x58] sm:$0xff]  ;;  %v1720_v42 = vld [vmem:[#allocation12 + $0x50] sm:$0xff] }
 0x6c7   : > { %2332 = vmatprep.subr.mxu0 %v2892_v7 }
 0x6d3   : > { %v2556_v43 = vpop.eup %2555 }
 0x6d4   : > { %2330 = vmatmul.mubr.msk.f32.vlgmr.msra.gmra.mxu0 %vm966_vm2, %v2556_v43  ;;  %v1498_v45 = vsel %vm966_vm2, %v2556_v43, 0.0  ;;  %v1719_v43 = vld [vmem:[#allocation12 + $0x48] sm:$0xff] }
 0x6d5   : > { %1499 = vadd.xlane.f32.xlu1 %v1498_v45  ;;  %2364 = vmatprep.mubr.msk.f32.mxu0 %vm2893_vm0, %v2892_v7  ;;  %v1718_v45 = vld [vmem:[#allocation12 + $0x40] sm:$0xff] }
 0x6d6   : > { %2333 = vmatpush3.msra.mxu0 %v1604_v48  ;;  %v1714_v48 = vld [vmem:[#allocation12 + $0x20] sm:$0xff] }
 0x6d7   : > { %2334 = vmatprep.subr.mxu0 %v2892_v7 }
 0x6d8   : > { %2335 = vmatpush3.msra.mxu0 %v1603_v49  ;;  %v1713_v49 = vld [vmem:[#allocation12 + $0x18] sm:$0xff] }
 0x6d9   : > { %2336 = vmatprep.subr.mxu0 %v2892_v7 }
 0x6da   : > { %2337 = vmatpush3.msra.mxu0 %v1602_v50  ;;  %v1712_v50 = vld [vmem:[#allocation12 + $0x10] sm:$0xff] }
 0x6db   : > { %2338 = vmatprep.subr.mxu0 %v2892_v7 }
 0x6dc   : > { %2339 = vmatpush3.msra.mxu0 %v1601_v51  ;;  %v1711_v51 = vld [vmem:[#allocation12 + $0x8] sm:$0xff] }
 0x6dd   : > { %2340 = vmatprep.subr.mxu0 %v2892_v7 }
 0x6de   : > { %2341 = vmatpush3.msra.mxu0 %v1600_v52  ;;  %v1710_v52 = vld [vmem:[#allocation12] sm:$0xff] }
 0x6df   : > { %2342 = vmatprep.subr.mxu0 %v2892_v7 }
 0x6e0   : > { %2343 = vmatpush3.msra.mxu0 %v1599_v53  ;;  %v1858_v53 = vld [vmem:[#allocation14 + $0xf8] sm:$0xff] }
 0x6e1   : > { %2344 = vmatprep.subr.mxu0 %v2892_v7 }
 0x6e2   : > { %2345 = vmatpush3.msra.mxu0 %v1598_v54  ;;  %v1842_v54 = vld [vmem:[#allocation14 + $0x78] sm:$0xff] }
 0x6e3   : > { %2346 = vmatprep.subr.mxu0 %v2892_v7 }
 0x6e4   : > { %2347 = vmatpush3.msra.mxu0 %v1597_v55  ;;  %v1857_v55 = vld [vmem:[#allocation14 + $0xf0] sm:$0xff] }
 0x6e5   : > { %2348 = vmatprep.subr.mxu0 %v2892_v7 }
 0x6e6   : > { %2349 = vmatpush3.msra.mxu0 %v1596_v56  ;;  %v1841_v56 = vld [vmem:[#allocation14 + $0x70] sm:$0xff] }
 0x6e7   : > { %2350 = vmatprep.subr.mxu0 %v2892_v7 }
 0x6e8   : > { %2351 = vmatpush3.msra.mxu0 %v1595_v57  ;;  %v1856_v57 = vld [vmem:[#allocation14 + $0xe8] sm:$0xff] }
 0x6e9   : > { %2352 = vmatprep.subr.mxu0 %v2892_v7 }
 0x6ea   : > { %2353 = vmatpush3.msra.mxu0 %v1594_v58  ;;  %v1840_v58 = vld [vmem:[#allocation14 + $0x68] sm:$0xff] }
 0x6eb   : > { %2354 = vmatprep.subr.mxu0 %v2892_v7 }
 0x6ec   : > { %2355 = vmatpush3.msra.mxu0 %v1593_v59  ;;  %v1855_v59 = vld [vmem:[#allocation14 + $0xe0] sm:$0xff] }
 0x6ed   : > { %2356 = vmatprep.subr.mxu0 %v2892_v7 }
 0x6ee   : > { %2357 = vmatpush3.msra.mxu0 %v1592_v63  ;;  %v1853_v63 = vld [vmem:[#allocation14 + $0xd0] sm:$0xff] }
 0x6ef   : > { %2358 = vmatprep.subr.mxu0 %v2892_v7 }
 0x6f0   : > { %2359 = vmatpush3.msra.mxu0 %v1591_v0  ;;  %v1837_v0 = vld [vmem:[#allocation14 + $0x50] sm:$0xff] }
 0x6f1   : > { %2360 = vmatprep.subr.mxu0 %v2892_v7 }
 0x6f2   : > { %2361 = vmatpush3.msra.mxu0 %v1590_v2  ;;  %v1852_v2 = vld [vmem:[#allocation14 + $0xc8] sm:$0xff] }
 0x6f3   : > { %2362 = vmatprep.subr.mxu0 %v2892_v7 }
 0x6f4   : > { %2363 = vmatpush3.msra.mxu0 %v1589_v3  ;;  %v1836_v3 = vld [vmem:[#allocation14 + $0x48] sm:$0xff] }
 0x6f5   : > { %2206 = vmatprep.subr.mxu0 %v1858_v53 }
 0x6f6   : > { %v1142_v44 = vpop.xlane.xlu1 %1141 }
 0x6f7   : > { %2557 = vrcp.f32 %v1142_v44  ;;  %v1717_v44 = vld [vmem:[#allocation12 + $0x38] sm:$0xff] }
 0x704   : > { %v2558_v46 = vpop.eup %2557 }
 0x705   : > { %v1225_v47 = vmul.f32 %v2558_v46, %v1221_v23  ;;  %v1733_v23 = vld [vmem:[#allocation12 + $0xb8] sm:$0xff]  ;;  %v1716_v46 = vld [vmem:[#allocation12 + $0x30] sm:$0xff] }
 0x706   : > { %1762 = vmatprep.subr.mxu1 %v1733_v23  ;;  %v1845_v23 = vld [vmem:[#allocation14 + $0x90] sm:$0xff] }
 0x707   : > { %1227 = vrot.lane.b32.xlu1 %v1225_v47, %s2896_s13  ;;  %1763 = vmatpush1.msra.mxu1 %v1732_v29  ;;  %v1715_v47 = vld [vmem:[#allocation12 + $0x28] sm:$0xff]  ;;  %v1829_v29 = vld [vmem:[#allocation14 + $0x10] sm:$0xff]  ;;  %s2143_s13 = sshll.u32 %s3530_s10, 1 }
 0x708   : > { %1764 = vmatprep.subr.mxu1 %v1731_v30  ;;  %v1844_v30 = vld [vmem:[#allocation14 + $0x88] sm:$0xff]  ;;  %s1950_s8 = sadd.s32 %s3523_s11, %s2143_s13  ;;  %s2897_s13 = smov [#allocation15]  }
 0x709   : > { %1765 = vmatpush1.msra.mxu1 %v1730_v31  ;;  %v1828_v31 = vld [vmem:[#allocation14 + $0x8] sm:$0xff]  ;;  %s2144_s30 = sshll.u32 %s1950_s8, 7  ;;  %s2751_s6 = sshll.u32 %s2897_s13, 4  ;;  %s2752_s6 = int_to_ptr.vmem [resolvable:$false] %s2751_s6 }
 0x70a   : > { %1766 = vmatprep.subr.mxu1 %v1729_v32  ;;  %v1827_v32 = vld [vmem:[#allocation14] sm:$0xff] }
 0x70b   : > { %1767 = vmatpush1.msra.mxu1 %v1728_v33  ;;  %v1742_v33 = vld [vmem:[%s3531_s7] sm:$0x3]  ;;  %s1952_s7 = scalar_lea.hbm %s3533_s25, %s2144_s30 }
 0x70c   : > { %1768 = vmatprep.subr.mxu1 %v1727_v34  ;;  %v1747_v34 = vrot.slane %v1742_v33, %v707_v19  ;;  %v2141_v19 = vld [vmem:[%s3532_s4] ss:$0 sm:$0xff] }
 0x70d   : > { %1769 = vmatpush1.msra.mxu1 %v1726_v35  ;;  %v1751_v35 = vrot.slane %v1742_v33, %v711_v38 }
 0x70e   : > { %1770 = vmatprep.subr.mxu1 %v1725_v36 }
 0x70f   : > { %1771 = vmatpush1.msra.mxu1 %v1724_v37 }
 0x710   : > { %1772 = vmatprep.subr.mxu1 %v1723_v39 }
 0x711   : > { %1773 = vmatpush1.msra.mxu1 %v1722_v40 }
 0x712   : > { %1774 = vmatprep.subr.mxu1 %v1721_v41 }
 0x713   : > { %1775 = vmatpush1.msra.mxu1 %v1720_v42 }
 0x714   : > { %1776 = vmatprep.subr.mxu1 %v1719_v43 }
 0x715   : > { %1777 = vmatpush1.msra.mxu1 %v1718_v45 }
 0x716   : > { %1778 = vmatprep.subr.mxu1 %v1717_v44 }
 0x717   : > { %1779 = vmatpush1.msra.mxu1 %v1716_v46 }
 0x718   : > { %1780 = vmatprep.subr.mxu1 %v1715_v47 }
 0x719   : > { %1781 = vmatpush1.msra.mxu1 %v1714_v48 }
 0x71a   : > { %1782 = vmatprep.subr.mxu1 %v1713_v49 }
 0x71b   : > { %1783 = vmatpush1.msra.mxu1 %v1712_v50 }
 0x71c   : > { %1784 = vmatprep.subr.mxu1 %v1711_v51 }
 0x71d   : > { %1785 = vmatpush1.msra.mxu1 %v1710_v52 }
 0x75e   : > { %v1500_v60 = vpop.xlane.xlu1 %1499 }
 0x75f   : > { %2559 = vrcp.f32 %v1500_v60  ;;  %v1839_v60 = vld [vmem:[#allocation14 + $0x60] sm:$0xff] }
 0x76c   : > { %v2560_v4 = vpop.eup %2559 }
 0x779   : > { %v1228_v61 = vpop.permute.xlu1 %1227 }
 0x77a   : > { %1231 = vst.msk [vmem:[#allocation2] sm:$0xff] %vm1230_vm3, %v1228_v61  ;;  %v1854_v61 = vld [vmem:[#allocation14 + $0xd8] sm:$0xff] }
 0x77b   : > { %1409 = vst.msk [vmem:[#allocation2] sm:$0xff] %vm1408_vm4, %v1406_v62  ;;  %v1838_v62 = vld [vmem:[#allocation14 + $0x58] sm:$0xff] }
 0x794   : > { %v1577_v5 = vpop.f32.mrf.mxu0 }
 0x795   : > { %v1581_v6 = vmul.f32 %v2560_v4, %v1577_v5  ;;  %v1851_v4 = vld [vmem:[#allocation14 + $0xc0] sm:$0xff] }
 0x796   : > { %v2331_v8 = vpop.f32.mrf.mxu0  ;;  %v1835_v5 = vld [vmem:[#allocation14 + $0x40] sm:$0xff] }
 0x797   : > { %1583 = vrot.lane.b32.xlu1 %v1581_v6, %s2894_s14  ;;  %v1850_v6 = vld [vmem:[#allocation14 + $0xb8] sm:$0xff]  ;;  %s609_s14 = sand.u32 1, %s2843_s19  }
 0x798   : > { %v1834_v8 = vld [vmem:[#allocation14 + $0x38] sm:$0xff]  ;;  %s2117_s3 = sshll.u32 %s609_s14, 3  ;;  %s1939_s10 = scalar_lea.sflag [#allocation5], %s609_s14 }
 0x799   : > { %s611_s2 = scalar_lea.vmem [#allocation15], %s2117_s3  ;;  %s2753_s3 = scalar_lea.vmem %s2752_s6, 256 }
 0x79a   : > { %s1954_s16 = sshll.u32 %s611_s2, 4  ;;  %s1955_s16 = int_to_ptr.vmem [resolvable:$true] %s1954_s16 }
 0x79b   : > { %s2747_s11 = scalar_lea.vmem %s1955_s16, 128  ;;  %p2754_p9 = scmp.lt.s32.totalorder %s1955_s16, %s2752_s6 }
 0x79c   : > { %p2748_p11 = scmp.ne.s32.totalorder %s1955_s16, %s2747_s11  ;;  %p2755_p10 = scmp.lt.s32.totalorder %s2753_s3, %s2747_s11 }
 0x79e   : > { %p2749_p6 = pnand %p2748_p11, %p3155_p7  ;;  %p2756_p12 = por %p2755_p10, %p2754_p9 }
 0x7a0   : > { %p2750_p8 = pneg %p2749_p6 }
 0x7a2   : > { %p2757_p13 = pnand %p2756_p12, %p2750_p8 }
 0x809   : > { %v1584_v9 = vpop.permute.xlu1 %1583 }
 0x80a   : > { %1587 = vst.msk [vmem:[#allocation2] sm:$0xff] %vm1586_vm5, %v1584_v9  ;;  %v1849_v9 = vld [vmem:[#allocation14 + $0xb0] sm:$0xff] }
 0x811   : > { %v1588_v10 = vld [vmem:[#allocation2] sm:$0xff] }
 0x812   : > { %2365 = vmatmul.mubr.f32.vlgmr.msra.gmra.mxu0 %v1588_v10  ;;  %v1833_v10 = vld [vmem:[#allocation14 + $0x30] sm:$0xff] }
 0x813   : > { %2207 = vmatpush3.msra.mxu0 %v1842_v54 }
 0x814   : > { %2208 = vmatprep.subr.mxu0 %v1857_v55 }
 0x815   : > { %2209 = vmatpush3.msra.mxu0 %v1841_v56 }
 0x816   : > { %2210 = vmatprep.subr.mxu0 %v1856_v57 }
 0x817   : > { %2211 = vmatpush3.msra.mxu0 %v1840_v58 }
 0x818   : > { %2212 = vmatprep.subr.mxu0 %v1855_v59 }
 0x819   : > { %2213 = vmatpush3.msra.mxu0 %v1839_v60 }
 0x81a   : > { %2214 = vmatprep.subr.mxu0 %v1854_v61 }
 0x81b   : > { %2215 = vmatpush3.msra.mxu0 %v1838_v62 }
 0x81c   : > { %2216 = vmatprep.subr.mxu0 %v1853_v63 }
 0x81d   : > { %2217 = vmatpush3.msra.mxu0 %v1837_v0 }
 0x81e   : > { %2218 = vmatprep.subr.mxu0 %v1852_v2 }
 0x81f   : > { %2219 = vmatpush3.msra.mxu0 %v1836_v3 }
 0x820   : > { %2220 = vmatprep.subr.mxu0 %v1851_v4 }
 0x821   : > { %2221 = vmatpush3.msra.mxu0 %v1835_v5 }
 0x822   : > { %2222 = vmatprep.subr.mxu0 %v1850_v6 }
 0x823   : > { %2223 = vmatpush3.msra.mxu0 %v1834_v8 }
 0x824   : > { %2224 = vmatprep.subr.mxu0 %v1849_v9 }
 0x825   : > { %2225 = vmatpush3.msra.mxu0 %v1833_v10 }
 0x8d2   : > { %v1678_v12 = vpop.f32.mrf.mxu0 }
 0x8d3   : > { %v1679_v13 = vadd.f32 %v2138_v11, %v1678_v12  ;;  %v1848_v11 = vld [vmem:[#allocation14 + $0xa8] sm:$0xff] }
 0x8d4   : > { %v2366_v14 = vpop.f32.mrf.mxu0  ;;  %v1832_v12 = vld [vmem:[#allocation14 + $0x28] sm:$0xff]  ;;  %2226 = vmatprep.subr.mxu0 %v1848_v11 }
 0x8d5   : > { %v3378_v7 = vadd.f32 %v1679_v13, %v3208_v1  ;;  %v1847_v13 = vld [vmem:[#allocation14 + $0xa0] sm:$0xff]  ;;  %2227 = vmatpush3.msra.mxu0 %v1832_v12 }
 0x8d6   : > { %v1831_v14 = vld [vmem:[#allocation14 + $0x20] sm:$0xff]  ;;  %2228 = vmatprep.subr.mxu0 %v1847_v13 }
 0x8d7   : > { %1685 = vadd.xlane.f32.xlu1 %v3378_v7  ;;  %2229 = vmatpush3.msra.mxu0 %v1831_v14 }
 0x960   : > { %v1686_v1 = vpop.xlane.xlu1 %1685 }
 0x961   : > { %v1687_v26 = vmul.f32 0.0078125, %v1686_v1 }
 0x963   : > { %v3382_v27 = vsub.f32 %v3378_v7, %v1687_v26  ;;  %v1846_v26 = vld [vmem:[#allocation14 + $0x98] sm:$0xff] }
 0x964   : > { %2230 = vmatprep.subr.mxu0 %v1846_v26 }
 0x965   : > { %v1689_v18 = vmul.f32 %v3382_v27, %v3382_v27 }
 0x967   : > { %1690 = vadd.xlane.f32.xlu0 %v1689_v18  ;;  %v1830_v18 = vld [vmem:[#allocation14 + $0x18] sm:$0xff] }
 0x968   : > { %2231 = vmatpush3.msra.mxu0 %v1830_v18 }
 0x969   : > { %2232 = vmatprep.subr.mxu0 %v1845_v23 }
 0x96a   : > { %2233 = vmatpush3.msra.mxu0 %v1829_v29 }
 0x96b   : > { %2234 = vmatprep.subr.mxu0 %v1844_v30 }
 0x96c   : > { %2235 = vmatpush3.msra.mxu0 %v1828_v31 }
 0x9f0   : > { %v1691_v15 = vpop.xlane.xlu0 %1690 }
 0x9f1   : > { %v1692_v16 = vmul.f32 0.0078125, %v1691_v15 }
 0x9f3   : > { %v1693_v17 = vadd.f32 1e-05, %v1692_v16 }
 0x9f5   : > { %2561 = vrsqrt.f32 %v1693_v17 }
 0xa02   : > { %v2562_v20 = vpop.eup %2561 }
 0xa03   : > { %v1695_v22 = vmul.f32 %v2562_v20, %v3382_v27  ;;  %v1843_v27 = vld [vmem:[#allocation14 + $0x80] sm:$0xff] }
 0xa04   : > { %2236 = vmatprep.subr.mxu0 %v1843_v27 }
 0xa05   : > { %v1702_v25 = vmul.f32 %v2139_v21, %v1695_v22  ;;  %2237 = vmatpush3.msra.mxu0 %v1827_v32 }
 0xa07   : > { %v1709_v1 = vadd.f32 %v2140_v24, %v1702_v25 }
 0xa09   : > { %1819 = vmatmul.mubr.f32.vlgmr.msra.gmra.mxu1 %v1709_v1 }
 0xac9   : > { %v1820_v36 = vpop.f32.mrf.mxu1 }
 0xaca   : > { %v1821_v37 = vadd.f32 %v1820_v36, %v1747_v34 }
 0xacb   : > { %v1822_v39 = vpop.f32.mrf.mxu1 }
 0xacc   : > { %v1823_v40 = vadd.f32 %v1822_v39, %v1751_v35  ;;  %v1825_v42 = vmax.f32 %v1821_v37, 0.0 }
 0xace   : > { %v1826_v41 = vmax.f32 %v1823_v40, 0.0 }
 0xad0   : > { %1930 = vmatprep.mubr.f32.mxu0 %v1826_v41 }
 0xad1   : > { %1931 = vmatmul.mubr.f32.vlgmr.msra.gmra.mxu0 %v1825_v42 }
 0xb91   : > { %v2238_v43 = vpop.f32.mrf.mxu0 }
 0xb93   : > { %v2239_v28 = vpop.f32.mrf.mxu0 }
 0xb94   : > { %v2240_v38 = vadd.f32 %v2239_v28, %v2238_v43 }
 0xb96   : > { %v1933_v45 = vadd.f32 %v2240_v38, %v2141_v19 }
 0xb98   : > { %v1936_v44 = vadd.f32 %v1933_v45, %v3378_v7 }
 0xb9a   : > { %1937 = vst [vmem:[%s611_s2] sm:$0xff] %v1936_v44 }
 0xb9b   : > { %2760 = shalt.err (!%p2757_p13)
}
 0xb9c   : > { %s2761_s8 = scalar_lea.hbm %s1952_s7, 128  ;;  %s2765_s4 = scalar_lea.hbm %s3534_s5, 512 }
 0xb9d   : > { %p2762_p0 = scmp.ne.s32.totalorder %s1952_s7, %s2761_s8  ;;  %p2766_p1 = scmp.lt.s32.totalorder %s1952_s7, %s3534_s5 }
 0xb9e   : > { %p2767_p3 = scmp.lt.s32.totalorder %s2765_s4, %s2761_s8 }
 0xb9f   : > { %p2763_p2 = pnand %p2762_p0, %p3155_p7 }
 0xba0   : > { %p2768_p11 = por %p2767_p3, %p2766_p1 }
 0xba1   : > { %p2764_p5 = pneg %p2763_p2 }
 0xba3   : > { %p2769_p6 = pnand %p2768_p11, %p2764_p5 }
 0xba5   : > { %2772 = shalt.err (!%p2769_p6)
}
 0xba6   : > { %2393 = dma.vmem_to_hbm [thread:$0]  (%p3155_p7), %s1955_s16, 128, %s1952_s7, %s1939_s10  }
 0xba7 PF: > { %p2435_p8 = scmp.ge.s32.totalorder %s2879_s28, 2  ;;  %s1966_s9 = sand.u32 1, %s2839_s18  }
 0xba8   : > { %s1967_s21 = scalar_lea.sflag [#allocation5], %s1966_s9 }
 0xba9   : > { %p2419_p9 = pnand %p2435_p8, %p3165_p4 }
 0xbab   : > { %p2420_p10 = pneg %p2419_p9 }
 0xbad   : > { %2834 = dma.done.wait (%p2420_p10), %s1967_s21, 128  }
 0xbae   : > { %2836 = vsyncadd (%p2420_p10), %s1967_s21, 4294967168  ;;  %s34_s28 = sadd.s32 1, %s2879_s28   ;;  %s3535_s16 = sld [smem:[#allocation23_spill]] }
 0xbaf   : > { %p31_p12 = scmp.ge.s32.totalorder %s34_s28, 6   ;;  %s3536_s18 = smov %s2843_s19 }
 0xbb0   : > { %s3537_s19 = smov %s2847_s20  ;;  %s3538_s20 = smov %s3163_s1 }
 0xbb1   : > { %s3539_s21 = smov %s2855_s22  ;;  %s3540_s22 = smov %s2859_s23 }
 0xbb2   : > { %s3541_s23 = smov %s3160_s15  ;;  %s3542_s24 = smov %s2871_s26 }
 0xbb3   : > { %s3543_s25 = smov %s2875_s27  ;;  %s3544_s26 = smov %s3547_s29 }
 0xbb4   : > { %s3545_s27 = smov %s3535_s16  ;;  %33 = sbr.rel (!%p31_p12) target bundleno = 28 (0x1c), region = 150 }
 0xbb9   :  { %1972 = vsyncpa [#allocation4], 1 }
 0xbba   :  { %1974 = vsyncpa [#allocation4 + $0x1], 1 }
 0xbbb   :  { %1975 = vsyncpa [#allocation7], 1 }
 0xbbc   :  { %1976 = vsyncpa [#allocation10], 1 }
 0xbbd   :  { %1977 = vsyncpa [#allocation13], 1 }
 0xbbe   :  { %1978 = vsyncpa [#allocation5], 1 }
 0xbbf   :  { %1980 = vsyncpa [#allocation5 + $0x1], 1 }

</bundles_post_ra>
